<compile_context>
chip_gen: v6e
topology: v6e:2x2x1
jax: 0.10.0
libtpu: 0.0.40
codegen_flags: <defaults>
</compile_context>

<pallas_src>
import numpy as np

import jax
import jax.numpy as jnp
from jax.experimental import pallas as pl
from jax.experimental.pallas import tpu as pltpu


# --------------------------------- fused kernel ---------------------------------

def _make_unet_kernel(depth, H, W, F):
    f32 = jnp.float32
    Hs = [H >> d for d in range(depth)]
    Ws = [W >> d for d in range(depth)]

    def kernel(x_ref, *args):
        o_ref = args[-1]
        it = iter(args[:-1])
        init_w, init_b = next(it), next(it)
        enc = [(next(it), next(it)) for _ in range(depth)]
        gru = [(next(it), next(it)) for _ in range(depth)]   # fused [u;c] weight / bias
        dec = [(next(it), next(it)) for _ in range(depth)]
        fin_w, fin_b = next(it), next(it)

        def relu(v):
            return jnp.maximum(v, 0.0)

        def col_index(h, w):
            hw = h * w
            lane = jax.lax.broadcasted_iota(jnp.int32, (1, hw), 1)
            if (w & (w - 1)) == 0:
                return jnp.bitwise_and(lane, w - 1)
            return jax.lax.rem(lane, w)

        def shift_flat(x, off, hw):
            """y[:, p] = x[:, p + off] when 0 <= p + off < hw, else 0 (zero fill)."""
            if off == 0:
                return x
            c = x.shape[0]
            if off > 0:
                pad = jnp.zeros((c, off), f32)
                return jnp.concatenate([x[:, off:], pad], axis=1)
            pad = jnp.zeros((c, -off), f32)
            return jnp.concatenate([pad, x[:, :hw + off]], axis=1)

        def conv3x3(x, d, w_ref, b_ref):
            """Same-padded 3x3 conv as ONE (Cout, 9Cin) @ (9Cin, HW) matmul (exact)."""
            h, w = Hs[d], Ws[d]
            hw = h * w
            col = col_index(h, w)
            not_left = (col != 0).astype(f32)        # tap reading column j-1 invalid at j==0
            not_right = (col != w - 1).astype(f32)   # tap reading column j+1 invalid at j==W-1
            taps = []
            for dh in (-1, 0, 1):
                for dw in (-1, 0, 1):
                    t = shift_flat(x, dh * w + dw, hw)      # vertical OOB -> zero fill
                    if dw == -1:
                        t = t * not_left
                    elif dw == 1:
                        t = t * not_right
                    taps.append(t)
            im2col = jnp.concatenate(taps, axis=0)           # (9*Cin, hw)
            return jnp.dot(w_ref[...], im2col, preferred_element_type=f32) + b_ref[...]

        def maxpool2x2(x, d):
            """MaxPool2d(2): per-output-row vertical max + tiny (W, W/2) even/odd selects."""
            h, w = Hs[d], Ws[d]
            wo = w // 2
            r_i = jax.lax.broadcasted_iota(jnp.int32, (w, wo), 0)
            c_i = jax.lax.broadcasted_iota(jnp.int32, (w, wo), 1)
            sel_even = (r_i == 2 * c_i).astype(f32)
            sel_odd = (r_i == 2 * c_i + 1).astype(f32)
            rows = []
            for i in range(h // 2):
                ra = x[:, (2 * i) * w:(2 * i) * w + w]
                rb = x[:, (2 * i + 1) * w:(2 * i + 1) * w + w]
                rm = jnp.maximum(ra, rb)                     # vertical max, (C, w)
                rows.append(jnp.maximum(
                    jnp.dot(rm, sel_even, preferred_element_type=f32),
                    jnp.dot(rm, sel_odd, preferred_element_type=f32)))
            return jnp.concatenate(rows, axis=1)             # (C, (h//2)*(w//2))

        def upsample2x(x, d):
            """Nearest x2 upsample from level d+1 resolution to level d resolution."""
            ho, wo = Hs[d + 1], Ws[d + 1]
            w = Ws[d]
            r_i = jax.lax.broadcasted_iota(jnp.int32, (wo, w), 0)
            c_i = jax.lax.broadcasted_iota(jnp.int32, (wo, w), 1)
            dup = ((c_i == 2 * r_i) | (c_i == 2 * r_i + 1)).astype(f32)   # (wo, w)
            rows = []
            for i in range(ho):
                rd = jnp.dot(x[:, i * wo:(i + 1) * wo], dup,
                             preferred_element_type=f32)     # column duplication, (C, w)
                rows.append(rd)
                rows.append(rd)                              # row duplication
            return jnp.concatenate(rows, axis=1)             # (C, h*w) at level d

        # ------------------------------ forward ------------------------------
        x = x_ref[0]                                         # (Cin, H*W)
        cur = relu(jnp.dot(init_w[...], x, preferred_element_type=f32) + init_b[...])

        encoded = []
        for d in range(depth):
            e = relu(conv3x3(cur, d, *enc[d]))
            encoded.append(e)
            if d < depth - 1:
                cur = maxpool2x2(e, d)
        # Deepest maxpool, the MultiplyByScalar(0) base module and its upsample/merge
        # produce exact zeros and are eliminated (bit-identical output).

        cur = None
        for d in reversed(range(depth)):
            # ConvGRU skip with a fresh (zero) hidden state: the reset gate and every
            # hidden-state weight column are inert, so the cell reduces to
            #   skip = relu(conv_c(x)) * (1 - sigmoid(conv_u(x)))
            # TODO(synk): confnets' ConvGRUCell source was not provided; standard ConvGRU
            # gate convention with concat([x, h]) and invert_update_gate=True assumed.
            g = conv3x3(encoded[d], d, *gru[d])              # (2F, hw), fused gates
            u_pre = g[:F, :]
            c_pre = g[F:, :]
            skip = relu(c_pre) * (1.0 - jax.nn.sigmoid(u_pre))
            merged = skip if d == depth - 1 else upsample2x(cur, d) + skip
            cur = relu(conv3x3(merged, d, *dec[d]))

        out = jnp.dot(fin_w[...], cur, preferred_element_type=f32) + fin_b[...]
        o_ref[0, :, :] = out.astype(o_ref.dtype)

    return kernel


# ----------------------------------- wrapper -----------------------------------

def recurrent_unet_forward(params, x_nchw):
    """RecurrentUNet.forward(input_, sequence=False) with a fresh ConvGRU hidden state.

    x_nchw: (N, in_channels, H, W) float32 (NCHW, like the PyTorch module).
    returns (N, out_channels, H, W) float32.
    """
    depth = params["depth"]
    F = params["fmaps"]
    N, Cin, H, W = x_nchw.shape
    assert H % (2 ** depth) == 0 and W % (2 ** depth) == 0, "divisibility constraint"
    Cout = params["final"]["w"].shape[-1]
    HW = H * W

    # NCHW -> (N, C, H*W): a pure reshape, no transpose (lane-dense kernel I/O).
    x_flat = x_nchw.astype(jnp.float32).reshape(N, Cin, HW)

    def conv_w(w):                       # (K*K*Cin, Cout) -> (Cout, K*K*Cin)
        return jnp.transpose(w.astype(jnp.float32), (1, 0))

    def conv_b(b):                       # (1, Cout) -> (Cout, 1)
        return jnp.transpose(b.astype(jnp.float32), (1, 0))

    def gru_x_half(w):                   # (9*2F, F) -> (F, 9*F): keep x columns (h == 0)
        wr = w.astype(jnp.float32).reshape(9, 2 * F, F)[:, :F, :]   # (tap, ci_x, co)
        return jnp.transpose(wr, (2, 0, 1)).reshape(F, 9 * F)

    flat = [conv_w(params["init"]["w"]), conv_b(params["init"]["b"])]
    for d in range(depth):
        flat += [conv_w(params["enc"][d]["w"]), conv_b(params["enc"][d]["b"])]
    for d in range(depth):
        g = params["gru"][d]
        flat += [jnp.concatenate([gru_x_half(g["wu"]), gru_x_half(g["wc"])], axis=0),
                 jnp.concatenate([conv_b(g["bu"]), conv_b(g["bc"])], axis=0)]
    for d in range(depth):
        flat += [conv_w(params["dec"][d]["w"]), conv_b(params["dec"][d]["b"])]
    flat += [conv_w(params["final"]["w"]), conv_b(params["final"]["b"])]

    in_specs = [pl.BlockSpec((1, Cin, HW), lambda n: (n, 0, 0))]
    for a in flat:
        in_specs.append(pl.BlockSpec(a.shape, lambda n: (0, 0)))   # resident parameters

    # Advisory cost estimate for XLA's scheduler (covers all N batch elements).
    flops = 2 * (Cin + Cout) * F * HW
    trans = 0
    for d in range(depth):
        hwd = (H >> d) * (W >> d)
        flops += 4 * 2 * 9 * F * F * hwd          # enc + dec + fused GRU gate convs
        flops += 8 * F * hwd                      # gates, merge, pooling arithmetic
        trans += F * hwd                          # sigmoid
    param_bytes = sum(int(np.prod(a.shape)) for a in flat) * 4
    cost = pl.CostEstimate(
        flops=int(N * flops),
        transcendentals=int(N * trans),
        bytes_accessed=int(N * (Cin + Cout) * HW * 4 + param_bytes))

    kernel = _make_unet_kernel(depth, H, W, F)

    out_flat = pl.pallas_call(
        kernel,
        out_shape=jax.ShapeDtypeStruct((N, Cout, HW), jnp.float32),
        grid=(N,),
        in_specs=in_specs,
        out_specs=pl.BlockSpec((1, Cout, HW), lambda n: (n, 0, 0)),
        compiler_params=pltpu.CompilerParams(
            dimension_semantics=("parallel",),
            vmem_limit_bytes=32 * 1024 * 1024),
        cost_estimate=cost,
    )(x_flat, *flat)

    return out_flat.reshape(N, Cout, H, W)


# ------------------------------ synthetic parameters ------------------------------

def init_params(key, *, depth=2, in_channels=4, out_channels=3, fmaps=8, hidden_kernel=3):
    """Deterministic synthetic parameters; shapes follow the module's __init__.

    Conv weights are flattened: w[(kh*K + kw)*Cin + ci, co] == w_pt[co, ci, kh, kw].
    """
    assert hidden_kernel == 3, "kernel implements the module default hidden_kernel_size=3"
    F = fmaps
    keys = iter(jax.random.split(key, 64))

    def conv_param(cin, cout, k):
        w = jax.random.normal(next(keys), (k * k * cin, cout), jnp.float32) / np.sqrt(cin * k * k)
        b = jax.random.normal(next(keys), (1, cout), jnp.float32) * 0.05
        return {"w": w, "b": b}

    params = {
        "depth": depth,
        "fmaps": F,
        "init": conv_param(in_channels, F, 1),
        "enc": [conv_param(F, F, 3) for _ in range(depth)],
        "dec": [conv_param(F, F, 3) for _ in range(depth)],
        "final": conv_param(F, out_channels, 1),
        "gru": [],
    }
    for _ in range(depth):
        g = {}
        for name in ("u", "r", "c"):      # gates see concat([x, h]); 'r' is inert for h == 0
            cp = conv_param(F + F, F, hidden_kernel)
            g["w" + name] = cp["w"]
            g["b" + name] = cp["b"]
        params["gru"].append(g)
    return params


if __name__ == "__main__":
    key = jax.random.PRNGKey(0)
    k_x, k_p = jax.random.split(key)

    # batch=2, in_channels=4, 16x16 spatial (satisfies the [4, 4] divisibility constraint
    # for depth=2), fmaps=8, out_channels=3.
    x = jax.random.normal(k_x, (2, 4, 16, 16), jnp.float32)            # NCHW
    params = init_params(k_p, depth=2, in_channels=4, out_channels=3, fmaps=8)

    y = recurrent_unet_forward(params, x)
    y = jax.block_until_ready(y)
    assert y.shape == (2, 3, 16, 16), y.shape
    assert bool(jnp.all(jnp.isfinite(y)))
    print("KERNEL_OK")
</pallas_src>

<mosaic_0001>
module attributes {stable_mosaic.version = 11 : i64} {
  func.func @kernel(%arg0: i32, %arg1: memref<1x4x256xf32, #tpu.memory_space<vmem>>, %arg2: memref<8x4xf32, #tpu.memory_space<vmem>>, %arg3: memref<8x1xf32, #tpu.memory_space<vmem>>, %arg4: memref<8x72xf32, #tpu.memory_space<vmem>>, %arg5: memref<8x1xf32, #tpu.memory_space<vmem>>, %arg6: memref<8x72xf32, #tpu.memory_space<vmem>>, %arg7: memref<8x1xf32, #tpu.memory_space<vmem>>, %arg8: memref<16x72xf32, #tpu.memory_space<vmem>>, %arg9: memref<16x1xf32, #tpu.memory_space<vmem>>, %arg10: memref<16x72xf32, #tpu.memory_space<vmem>>, %arg11: memref<16x1xf32, #tpu.memory_space<vmem>>, %arg12: memref<8x72xf32, #tpu.memory_space<vmem>>, %arg13: memref<8x1xf32, #tpu.memory_space<vmem>>, %arg14: memref<8x72xf32, #tpu.memory_space<vmem>>, %arg15: memref<8x1xf32, #tpu.memory_space<vmem>>, %arg16: memref<3x8xf32, #tpu.memory_space<vmem>>, %arg17: memref<3x1xf32, #tpu.memory_space<vmem>>, %arg18: memref<1x3x256xf32, #tpu.memory_space<vmem>>) attributes {dimension_semantics = [#tpu.dimension_semantics<parallel>], iteration_bounds = array<i64: 2>, scalar_prefetch = 0 : i64, scratch_operands = 0 : i64, tpu.core_type = #tpu.core_type<tc>, window_params = [{transform_indices = @transform_0, window_bounds = array<i64: 1, 4, 256>}, {pipeline_mode = #tpu.pipeline_mode<synchronous>, transform_indices = @transform_1, window_bounds = array<i64: 8, 4>}, {pipeline_mode = #tpu.pipeline_mode<synchronous>, transform_indices = @transform_2, window_bounds = array<i64: 8, 1>}, {pipeline_mode = #tpu.pipeline_mode<synchronous>, transform_indices = @transform_3, window_bounds = array<i64: 8, 72>}, {pipeline_mode = #tpu.pipeline_mode<synchronous>, transform_indices = @transform_4, window_bounds = array<i64: 8, 1>}, {pipeline_mode = #tpu.pipeline_mode<synchronous>, transform_indices = @transform_5, window_bounds = array<i64: 8, 72>}, {pipeline_mode = #tpu.pipeline_mode<synchronous>, transform_indices = @transform_6, window_bounds = array<i64: 8, 1>}, {pipeline_mode = #tpu.pipeline_mode<synchronous>, transform_indices = @transform_7, window_bounds = array<i64: 16, 72>}, {pipeline_mode = #tpu.pipeline_mode<synchronous>, transform_indices = @transform_8, window_bounds = array<i64: 16, 1>}, {pipeline_mode = #tpu.pipeline_mode<synchronous>, transform_indices = @transform_9, window_bounds = array<i64: 16, 72>}, {pipeline_mode = #tpu.pipeline_mode<synchronous>, transform_indices = @transform_10, window_bounds = array<i64: 16, 1>}, {pipeline_mode = #tpu.pipeline_mode<synchronous>, transform_indices = @transform_11, window_bounds = array<i64: 8, 72>}, {pipeline_mode = #tpu.pipeline_mode<synchronous>, transform_indices = @transform_12, window_bounds = array<i64: 8, 1>}, {pipeline_mode = #tpu.pipeline_mode<synchronous>, transform_indices = @transform_13, window_bounds = array<i64: 8, 72>}, {pipeline_mode = #tpu.pipeline_mode<synchronous>, transform_indices = @transform_14, window_bounds = array<i64: 8, 1>}, {pipeline_mode = #tpu.pipeline_mode<synchronous>, transform_indices = @transform_15, window_bounds = array<i64: 3, 8>}, {pipeline_mode = #tpu.pipeline_mode<synchronous>, transform_indices = @transform_16, window_bounds = array<i64: 3, 1>}, {transform_indices = @transform_17, window_bounds = array<i64: 1, 3, 256>}]} {
    %c0 = arith.constant 0 : index
    %c0_0 = arith.constant 0 : index
    %c0_1 = arith.constant 0 : index
    %0 = vector.load %arg1[%c0, %c0_0, %c0_1] : memref<1x4x256xf32, #tpu.memory_space<vmem>>, vector<1x4x256xf32>
    %1 = vector.shape_cast %0 : vector<1x4x256xf32> to vector<4x256xf32>
    %c0_2 = arith.constant 0 : index
    %c0_3 = arith.constant 0 : index
    %2 = vector.load %arg2[%c0_2, %c0_3] : memref<8x4xf32, #tpu.memory_space<vmem>>, vector<8x4xf32>
    %cst = arith.constant dense<0.000000e+00> : vector<8x256xf32>
    %3 = tpu.matmul %2, %1, %cst {dimension_numbers = #tpu.dot_dimension_numbers<[1], [0], [0], [1], [0, 0, 1, 1], [], []>} : vector<8x4xf32>, vector<4x256xf32>, vector<8x256xf32> -> vector<8x256xf32>
    %c0_4 = arith.constant 0 : index
    %c0_5 = arith.constant 0 : index
    %4 = vector.load %arg3[%c0_4, %c0_5] : memref<8x1xf32, #tpu.memory_space<vmem>>, vector<8x1xf32>
    %5 = vector.broadcast %4 : vector<8x1xf32> to vector<8x256xf32>
    %6 = arith.addf %3, %5 : vector<8x256xf32>
    %cst_6 = arith.constant 0.000000e+00 : f32
    %7 = vector.broadcast %cst_6 : f32 to vector<8x256xf32>
    %8 = arith.maximumf %6, %7 : vector<8x256xf32>
    %9 = tpu.iota {dimensions = array<i32: 1>} : vector<1x256xi32>
    %c15_i32 = arith.constant 15 : i32
    %10 = vector.broadcast %c15_i32 : i32 to vector<1x256xi32>
    %11 = arith.andi %9, %10 : vector<1x256xi32>
    %c0_i32 = arith.constant 0 : i32
    %12 = vector.broadcast %c0_i32 : i32 to vector<1x256xi32>
    %13 = arith.cmpi ne, %11, %12 : vector<1x256xi32>
    %14 = arith.extui %13 : vector<1x256xi1> to vector<1x256xi32>
    %15 = arith.sitofp %14 : vector<1x256xi32> to vector<1x256xf32>
    %c15_i32_7 = arith.constant 15 : i32
    %16 = vector.broadcast %c15_i32_7 : i32 to vector<1x256xi32>
    %17 = arith.cmpi ne, %11, %16 : vector<1x256xi32>
    %18 = arith.extui %17 : vector<1x256xi1> to vector<1x256xi32>
    %19 = arith.sitofp %18 : vector<1x256xi32> to vector<1x256xf32>
    %cst_8 = arith.constant 0.000000e+00 : f32
    %20 = vector.broadcast %cst_8 : f32 to vector<8x17xf32>
    %21 = vector.extract_strided_slice %8 {offsets = [0, 0], sizes = [8, 239], strides = [1, 1]} : vector<8x256xf32> to vector<8x239xf32>
    %22 = tpu.concatenate %20, %21 in 1 : vector<8x17xf32>, vector<8x239xf32> -> vector<8x256xf32>
    %23 = vector.broadcast %15 : vector<1x256xf32> to vector<8x256xf32>
    %24 = arith.mulf %22, %23 : vector<8x256xf32>
    %cst_9 = arith.constant 0.000000e+00 : f32
    %25 = vector.broadcast %cst_9 : f32 to vector<8x16xf32>
    %26 = vector.extract_strided_slice %8 {offsets = [0, 0], sizes = [8, 240], strides = [1, 1]} : vector<8x256xf32> to vector<8x240xf32>
    %27 = tpu.concatenate %25, %26 in 1 : vector<8x16xf32>, vector<8x240xf32> -> vector<8x256xf32>
    %cst_10 = arith.constant 0.000000e+00 : f32
    %28 = vector.broadcast %cst_10 : f32 to vector<8x15xf32>
    %29 = vector.extract_strided_slice %8 {offsets = [0, 0], sizes = [8, 241], strides = [1, 1]} : vector<8x256xf32> to vector<8x241xf32>
    %30 = tpu.concatenate %28, %29 in 1 : vector<8x15xf32>, vector<8x241xf32> -> vector<8x256xf32>
    %31 = vector.broadcast %19 : vector<1x256xf32> to vector<8x256xf32>
    %32 = arith.mulf %30, %31 : vector<8x256xf32>
    %cst_11 = arith.constant 0.000000e+00 : f32
    %33 = vector.broadcast %cst_11 : f32 to vector<8x1xf32>
    %34 = vector.extract_strided_slice %8 {offsets = [0, 0], sizes = [8, 255], strides = [1, 1]} : vector<8x256xf32> to vector<8x255xf32>
    %35 = tpu.concatenate %33, %34 in 1 : vector<8x1xf32>, vector<8x255xf32> -> vector<8x256xf32>
    %36 = vector.broadcast %15 : vector<1x256xf32> to vector<8x256xf32>
    %37 = arith.mulf %35, %36 : vector<8x256xf32>
    %cst_12 = arith.constant 0.000000e+00 : f32
    %38 = vector.broadcast %cst_12 : f32 to vector<8x1xf32>
    %39 = vector.extract_strided_slice %8 {offsets = [0, 1], sizes = [8, 255], strides = [1, 1]} : vector<8x256xf32> to vector<8x255xf32>
    %40 = tpu.concatenate %39, %38 in 1 : vector<8x255xf32>, vector<8x1xf32> -> vector<8x256xf32>
    %41 = vector.broadcast %19 : vector<1x256xf32> to vector<8x256xf32>
    %42 = arith.mulf %40, %41 : vector<8x256xf32>
    %cst_13 = arith.constant 0.000000e+00 : f32
    %43 = vector.broadcast %cst_13 : f32 to vector<8x15xf32>
    %44 = vector.extract_strided_slice %8 {offsets = [0, 15], sizes = [8, 241], strides = [1, 1]} : vector<8x256xf32> to vector<8x241xf32>
    %45 = tpu.concatenate %44, %43 in 1 : vector<8x241xf32>, vector<8x15xf32> -> vector<8x256xf32>
    %46 = vector.broadcast %15 : vector<1x256xf32> to vector<8x256xf32>
    %47 = arith.mulf %45, %46 : vector<8x256xf32>
    %cst_14 = arith.constant 0.000000e+00 : f32
    %48 = vector.broadcast %cst_14 : f32 to vector<8x16xf32>
    %49 = vector.extract_strided_slice %8 {offsets = [0, 16], sizes = [8, 240], strides = [1, 1]} : vector<8x256xf32> to vector<8x240xf32>
    %50 = tpu.concatenate %49, %48 in 1 : vector<8x240xf32>, vector<8x16xf32> -> vector<8x256xf32>
    %cst_15 = arith.constant 0.000000e+00 : f32
    %51 = vector.broadcast %cst_15 : f32 to vector<8x17xf32>
    %52 = vector.extract_strided_slice %8 {offsets = [0, 17], sizes = [8, 239], strides = [1, 1]} : vector<8x256xf32> to vector<8x239xf32>
    %53 = tpu.concatenate %52, %51 in 1 : vector<8x239xf32>, vector<8x17xf32> -> vector<8x256xf32>
    %54 = vector.broadcast %19 : vector<1x256xf32> to vector<8x256xf32>
    %55 = arith.mulf %53, %54 : vector<8x256xf32>
    %56 = tpu.concatenate %24, %27, %32, %37, %8, %42, %47, %50, %55 in 0 : vector<8x256xf32>, vector<8x256xf32>, vector<8x256xf32>, vector<8x256xf32>, vector<8x256xf32>, vector<8x256xf32>, vector<8x256xf32>, vector<8x256xf32>, vector<8x256xf32> -> vector<72x256xf32>
    %c0_16 = arith.constant 0 : index
    %c0_17 = arith.constant 0 : index
    %57 = vector.load %arg4[%c0_16, %c0_17] : memref<8x72xf32, #tpu.memory_space<vmem>>, vector<8x72xf32>
    %cst_18 = arith.constant dense<0.000000e+00> : vector<8x256xf32>
    %58 = tpu.matmul %57, %56, %cst_18 {dimension_numbers = #tpu.dot_dimension_numbers<[1], [0], [0], [1], [0, 0, 1, 1], [], []>} : vector<8x72xf32>, vector<72x256xf32>, vector<8x256xf32> -> vector<8x256xf32>
    %c0_19 = arith.constant 0 : index
    %c0_20 = arith.constant 0 : index
    %59 = vector.load %arg5[%c0_19, %c0_20] : memref<8x1xf32, #tpu.memory_space<vmem>>, vector<8x1xf32>
    %60 = vector.broadcast %59 : vector<8x1xf32> to vector<8x256xf32>
    %61 = arith.addf %58, %60 : vector<8x256xf32>
    %cst_21 = arith.constant 0.000000e+00 : f32
    %62 = vector.broadcast %cst_21 : f32 to vector<8x256xf32>
    %63 = arith.maximumf %61, %62 : vector<8x256xf32>
    %64 = tpu.iota {dimensions = array<i32: 0>} : vector<16x8xi32>
    %65 = tpu.iota {dimensions = array<i32: 1>} : vector<16x8xi32>
    %c2_i32 = arith.constant 2 : i32
    %66 = vector.broadcast %c2_i32 : i32 to vector<16x8xi32>
    %67 = arith.muli %66, %65 : vector<16x8xi32>
    %68 = arith.cmpi eq, %64, %67 : vector<16x8xi32>
    %69 = arith.extui %68 : vector<16x8xi1> to vector<16x8xi32>
    %70 = arith.sitofp %69 : vector<16x8xi32> to vector<16x8xf32>
    %c2_i32_22 = arith.constant 2 : i32
    %71 = vector.broadcast %c2_i32_22 : i32 to vector<16x8xi32>
    %72 = arith.muli %71, %65 : vector<16x8xi32>
    %c1_i32 = arith.constant 1 : i32
    %73 = vector.broadcast %c1_i32 : i32 to vector<16x8xi32>
    %74 = arith.addi %72, %73 : vector<16x8xi32>
    %75 = arith.cmpi eq, %64, %74 : vector<16x8xi32>
    %76 = arith.extui %75 : vector<16x8xi1> to vector<16x8xi32>
    %77 = arith.sitofp %76 : vector<16x8xi32> to vector<16x8xf32>
    %78 = vector.extract_strided_slice %63 {offsets = [0, 0], sizes = [8, 16], strides = [1, 1]} : vector<8x256xf32> to vector<8x16xf32>
    %79 = vector.extract_strided_slice %63 {offsets = [0, 16], sizes = [8, 16], strides = [1, 1]} : vector<8x256xf32> to vector<8x16xf32>
    %80 = arith.maximumf %78, %79 : vector<8x16xf32>
    %cst_23 = arith.constant dense<0.000000e+00> : vector<8x8xf32>
    %81 = tpu.matmul %80, %70, %cst_23 {dimension_numbers = #tpu.dot_dimension_numbers<[1], [0], [0], [1], [0, 0, 1, 1], [], []>} : vector<8x16xf32>, vector<16x8xf32>, vector<8x8xf32> -> vector<8x8xf32>
    %cst_24 = arith.constant dense<0.000000e+00> : vector<8x8xf32>
    %82 = tpu.matmul %80, %77, %cst_24 {dimension_numbers = #tpu.dot_dimension_numbers<[1], [0], [0], [1], [0, 0, 1, 1], [], []>} : vector<8x16xf32>, vector<16x8xf32>, vector<8x8xf32> -> vector<8x8xf32>
    %83 = arith.maximumf %81, %82 : vector<8x8xf32>
    %84 = vector.extract_strided_slice %63 {offsets = [0, 32], sizes = [8, 16], strides = [1, 1]} : vector<8x256xf32> to vector<8x16xf32>
    %85 = vector.extract_strided_slice %63 {offsets = [0, 48], sizes = [8, 16], strides = [1, 1]} : vector<8x256xf32> to vector<8x16xf32>
    %86 = arith.maximumf %84, %85 : vector<8x16xf32>
    %cst_25 = arith.constant dense<0.000000e+00> : vector<8x8xf32>
    %87 = tpu.matmul %86, %70, %cst_25 {dimension_numbers = #tpu.dot_dimension_numbers<[1], [0], [0], [1], [0, 0, 1, 1], [], []>} : vector<8x16xf32>, vector<16x8xf32>, vector<8x8xf32> -> vector<8x8xf32>
    %cst_26 = arith.constant dense<0.000000e+00> : vector<8x8xf32>
    %88 = tpu.matmul %86, %77, %cst_26 {dimension_numbers = #tpu.dot_dimension_numbers<[1], [0], [0], [1], [0, 0, 1, 1], [], []>} : vector<8x16xf32>, vector<16x8xf32>, vector<8x8xf32> -> vector<8x8xf32>
    %89 = arith.maximumf %87, %88 : vector<8x8xf32>
    %90 = vector.extract_strided_slice %63 {offsets = [0, 64], sizes = [8, 16], strides = [1, 1]} : vector<8x256xf32> to vector<8x16xf32>
    %91 = vector.extract_strided_slice %63 {offsets = [0, 80], sizes = [8, 16], strides = [1, 1]} : vector<8x256xf32> to vector<8x16xf32>
    %92 = arith.maximumf %90, %91 : vector<8x16xf32>
    %cst_27 = arith.constant dense<0.000000e+00> : vector<8x8xf32>
    %93 = tpu.matmul %92, %70, %cst_27 {dimension_numbers = #tpu.dot_dimension_numbers<[1], [0], [0], [1], [0, 0, 1, 1], [], []>} : vector<8x16xf32>, vector<16x8xf32>, vector<8x8xf32> -> vector<8x8xf32>
    %cst_28 = arith.constant dense<0.000000e+00> : vector<8x8xf32>
    %94 = tpu.matmul %92, %77, %cst_28 {dimension_numbers = #tpu.dot_dimension_numbers<[1], [0], [0], [1], [0, 0, 1, 1], [], []>} : vector<8x16xf32>, vector<16x8xf32>, vector<8x8xf32> -> vector<8x8xf32>
    %95 = arith.maximumf %93, %94 : vector<8x8xf32>
    %96 = vector.extract_strided_slice %63 {offsets = [0, 96], sizes = [8, 16], strides = [1, 1]} : vector<8x256xf32> to vector<8x16xf32>
    %97 = vector.extract_strided_slice %63 {offsets = [0, 112], sizes = [8, 16], strides = [1, 1]} : vector<8x256xf32> to vector<8x16xf32>
    %98 = arith.maximumf %96, %97 : vector<8x16xf32>
    %cst_29 = arith.constant dense<0.000000e+00> : vector<8x8xf32>
    %99 = tpu.matmul %98, %70, %cst_29 {dimension_numbers = #tpu.dot_dimension_numbers<[1], [0], [0], [1], [0, 0, 1, 1], [], []>} : vector<8x16xf32>, vector<16x8xf32>, vector<8x8xf32> -> vector<8x8xf32>
    %cst_30 = arith.constant dense<0.000000e+00> : vector<8x8xf32>
    %100 = tpu.matmul %98, %77, %cst_30 {dimension_numbers = #tpu.dot_dimension_numbers<[1], [0], [0], [1], [0, 0, 1, 1], [], []>} : vector<8x16xf32>, vector<16x8xf32>, vector<8x8xf32> -> vector<8x8xf32>
    %101 = arith.maximumf %99, %100 : vector<8x8xf32>
    %102 = vector.extract_strided_slice %63 {offsets = [0, 128], sizes = [8, 16], strides = [1, 1]} : vector<8x256xf32> to vector<8x16xf32>
    %103 = vector.extract_strided_slice %63 {offsets = [0, 144], sizes = [8, 16], strides = [1, 1]} : vector<8x256xf32> to vector<8x16xf32>
    %104 = arith.maximumf %102, %103 : vector<8x16xf32>
    %cst_31 = arith.constant dense<0.000000e+00> : vector<8x8xf32>
    %105 = tpu.matmul %104, %70, %cst_31 {dimension_numbers = #tpu.dot_dimension_numbers<[1], [0], [0], [1], [0, 0, 1, 1], [], []>} : vector<8x16xf32>, vector<16x8xf32>, vector<8x8xf32> -> vector<8x8xf32>
    %cst_32 = arith.constant dense<0.000000e+00> : vector<8x8xf32>
    %106 = tpu.matmul %104, %77, %cst_32 {dimension_numbers = #tpu.dot_dimension_numbers<[1], [0], [0], [1], [0, 0, 1, 1], [], []>} : vector<8x16xf32>, vector<16x8xf32>, vector<8x8xf32> -> vector<8x8xf32>
    %107 = arith.maximumf %105, %106 : vector<8x8xf32>
    %108 = vector.extract_strided_slice %63 {offsets = [0, 160], sizes = [8, 16], strides = [1, 1]} : vector<8x256xf32> to vector<8x16xf32>
    %109 = vector.extract_strided_slice %63 {offsets = [0, 176], sizes = [8, 16], strides = [1, 1]} : vector<8x256xf32> to vector<8x16xf32>
    %110 = arith.maximumf %108, %109 : vector<8x16xf32>
    %cst_33 = arith.constant dense<0.000000e+00> : vector<8x8xf32>
    %111 = tpu.matmul %110, %70, %cst_33 {dimension_numbers = #tpu.dot_dimension_numbers<[1], [0], [0], [1], [0, 0, 1, 1], [], []>} : vector<8x16xf32>, vector<16x8xf32>, vector<8x8xf32> -> vector<8x8xf32>
    %cst_34 = arith.constant dense<0.000000e+00> : vector<8x8xf32>
    %112 = tpu.matmul %110, %77, %cst_34 {dimension_numbers = #tpu.dot_dimension_numbers<[1], [0], [0], [1], [0, 0, 1, 1], [], []>} : vector<8x16xf32>, vector<16x8xf32>, vector<8x8xf32> -> vector<8x8xf32>
    %113 = arith.maximumf %111, %112 : vector<8x8xf32>
    %114 = vector.extract_strided_slice %63 {offsets = [0, 192], sizes = [8, 16], strides = [1, 1]} : vector<8x256xf32> to vector<8x16xf32>
    %115 = vector.extract_strided_slice %63 {offsets = [0, 208], sizes = [8, 16], strides = [1, 1]} : vector<8x256xf32> to vector<8x16xf32>
    %116 = arith.maximumf %114, %115 : vector<8x16xf32>
    %cst_35 = arith.constant dense<0.000000e+00> : vector<8x8xf32>
    %117 = tpu.matmul %116, %70, %cst_35 {dimension_numbers = #tpu.dot_dimension_numbers<[1], [0], [0], [1], [0, 0, 1, 1], [], []>} : vector<8x16xf32>, vector<16x8xf32>, vector<8x8xf32> -> vector<8x8xf32>
    %cst_36 = arith.constant dense<0.000000e+00> : vector<8x8xf32>
    %118 = tpu.matmul %116, %77, %cst_36 {dimension_numbers = #tpu.dot_dimension_numbers<[1], [0], [0], [1], [0, 0, 1, 1], [], []>} : vector<8x16xf32>, vector<16x8xf32>, vector<8x8xf32> -> vector<8x8xf32>
    %119 = arith.maximumf %117, %118 : vector<8x8xf32>
    %120 = vector.extract_strided_slice %63 {offsets = [0, 224], sizes = [8, 16], strides = [1, 1]} : vector<8x256xf32> to vector<8x16xf32>
    %121 = vector.extract_strided_slice %63 {offsets = [0, 240], sizes = [8, 16], strides = [1, 1]} : vector<8x256xf32> to vector<8x16xf32>
    %122 = arith.maximumf %120, %121 : vector<8x16xf32>
    %cst_37 = arith.constant dense<0.000000e+00> : vector<8x8xf32>
    %123 = tpu.matmul %122, %70, %cst_37 {dimension_numbers = #tpu.dot_dimension_numbers<[1], [0], [0], [1], [0, 0, 1, 1], [], []>} : vector<8x16xf32>, vector<16x8xf32>, vector<8x8xf32> -> vector<8x8xf32>
    %cst_38 = arith.constant dense<0.000000e+00> : vector<8x8xf32>
    %124 = tpu.matmul %122, %77, %cst_38 {dimension_numbers = #tpu.dot_dimension_numbers<[1], [0], [0], [1], [0, 0, 1, 1], [], []>} : vector<8x16xf32>, vector<16x8xf32>, vector<8x8xf32> -> vector<8x8xf32>
    %125 = arith.maximumf %123, %124 : vector<8x8xf32>
    %126 = tpu.concatenate %83, %89, %95, %101, %107, %113, %119, %125 in 1 : vector<8x8xf32>, vector<8x8xf32>, vector<8x8xf32>, vector<8x8xf32>, vector<8x8xf32>, vector<8x8xf32>, vector<8x8xf32>, vector<8x8xf32> -> vector<8x64xf32>
    %127 = tpu.iota {dimensions = array<i32: 1>} : vector<1x64xi32>
    %c7_i32 = arith.constant 7 : i32
    %128 = vector.broadcast %c7_i32 : i32 to vector<1x64xi32>
    %129 = arith.andi %127, %128 : vector<1x64xi32>
    %c0_i32_39 = arith.constant 0 : i32
    %130 = vector.broadcast %c0_i32_39 : i32 to vector<1x64xi32>
    %131 = arith.cmpi ne, %129, %130 : vector<1x64xi32>
    %132 = arith.extui %131 : vector<1x64xi1> to vector<1x64xi32>
    %133 = arith.sitofp %132 : vector<1x64xi32> to vector<1x64xf32>
    %c7_i32_40 = arith.constant 7 : i32
    %134 = vector.broadcast %c7_i32_40 : i32 to vector<1x64xi32>
    %135 = arith.cmpi ne, %129, %134 : vector<1x64xi32>
    %136 = arith.extui %135 : vector<1x64xi1> to vector<1x64xi32>
    %137 = arith.sitofp %136 : vector<1x64xi32> to vector<1x64xf32>
    %cst_41 = arith.constant 0.000000e+00 : f32
    %138 = vector.broadcast %cst_41 : f32 to vector<8x9xf32>
    %139 = vector.extract_strided_slice %126 {offsets = [0, 0], sizes = [8, 55], strides = [1, 1]} : vector<8x64xf32> to vector<8x55xf32>
    %140 = tpu.concatenate %138, %139 in 1 : vector<8x9xf32>, vector<8x55xf32> -> vector<8x64xf32>
    %141 = vector.broadcast %133 : vector<1x64xf32> to vector<8x64xf32>
    %142 = arith.mulf %140, %141 : vector<8x64xf32>
    %cst_42 = arith.constant 0.000000e+00 : f32
    %143 = vector.broadcast %cst_42 : f32 to vector<8x8xf32>
    %144 = vector.extract_strided_slice %126 {offsets = [0, 0], sizes = [8, 56], strides = [1, 1]} : vector<8x64xf32> to vector<8x56xf32>
    %145 = tpu.concatenate %143, %144 in 1 : vector<8x8xf32>, vector<8x56xf32> -> vector<8x64xf32>
    %cst_43 = arith.constant 0.000000e+00 : f32
    %146 = vector.broadcast %cst_43 : f32 to vector<8x7xf32>
    %147 = vector.extract_strided_slice %126 {offsets = [0, 0], sizes = [8, 57], strides = [1, 1]} : vector<8x64xf32> to vector<8x57xf32>
    %148 = tpu.concatenate %146, %147 in 1 : vector<8x7xf32>, vector<8x57xf32> -> vector<8x64xf32>
    %149 = vector.broadcast %137 : vector<1x64xf32> to vector<8x64xf32>
    %150 = arith.mulf %148, %149 : vector<8x64xf32>
    %cst_44 = arith.constant 0.000000e+00 : f32
    %151 = vector.broadcast %cst_44 : f32 to vector<8x1xf32>
    %152 = vector.extract_strided_slice %126 {offsets = [0, 0], sizes = [8, 63], strides = [1, 1]} : vector<8x64xf32> to vector<8x63xf32>
    %153 = tpu.concatenate %151, %152 in 1 : vector<8x1xf32>, vector<8x63xf32> -> vector<8x64xf32>
    %154 = vector.broadcast %133 : vector<1x64xf32> to vector<8x64xf32>
    %155 = arith.mulf %153, %154 : vector<8x64xf32>
    %cst_45 = arith.constant 0.000000e+00 : f32
    %156 = vector.broadcast %cst_45 : f32 to vector<8x1xf32>
    %157 = vector.extract_strided_slice %126 {offsets = [0, 1], sizes = [8, 63], strides = [1, 1]} : vector<8x64xf32> to vector<8x63xf32>
    %158 = tpu.concatenate %157, %156 in 1 : vector<8x63xf32>, vector<8x1xf32> -> vector<8x64xf32>
    %159 = vector.broadcast %137 : vector<1x64xf32> to vector<8x64xf32>
    %160 = arith.mulf %158, %159 : vector<8x64xf32>
    %cst_46 = arith.constant 0.000000e+00 : f32
    %161 = vector.broadcast %cst_46 : f32 to vector<8x7xf32>
    %162 = vector.extract_strided_slice %126 {offsets = [0, 7], sizes = [8, 57], strides = [1, 1]} : vector<8x64xf32> to vector<8x57xf32>
    %163 = tpu.concatenate %162, %161 in 1 : vector<8x57xf32>, vector<8x7xf32> -> vector<8x64xf32>
    %164 = vector.broadcast %133 : vector<1x64xf32> to vector<8x64xf32>
    %165 = arith.mulf %163, %164 : vector<8x64xf32>
    %cst_47 = arith.constant 0.000000e+00 : f32
    %166 = vector.broadcast %cst_47 : f32 to vector<8x8xf32>
    %167 = vector.extract_strided_slice %126 {offsets = [0, 8], sizes = [8, 56], strides = [1, 1]} : vector<8x64xf32> to vector<8x56xf32>
    %168 = tpu.concatenate %167, %166 in 1 : vector<8x56xf32>, vector<8x8xf32> -> vector<8x64xf32>
    %cst_48 = arith.constant 0.000000e+00 : f32
    %169 = vector.broadcast %cst_48 : f32 to vector<8x9xf32>
    %170 = vector.extract_strided_slice %126 {offsets = [0, 9], sizes = [8, 55], strides = [1, 1]} : vector<8x64xf32> to vector<8x55xf32>
    %171 = tpu.concatenate %170, %169 in 1 : vector<8x55xf32>, vector<8x9xf32> -> vector<8x64xf32>
    %172 = vector.broadcast %137 : vector<1x64xf32> to vector<8x64xf32>
    %173 = arith.mulf %171, %172 : vector<8x64xf32>
    %174 = tpu.concatenate %142, %145, %150, %155, %126, %160, %165, %168, %173 in 0 : vector<8x64xf32>, vector<8x64xf32>, vector<8x64xf32>, vector<8x64xf32>, vector<8x64xf32>, vector<8x64xf32>, vector<8x64xf32>, vector<8x64xf32>, vector<8x64xf32> -> vector<72x64xf32>
    %c0_49 = arith.constant 0 : index
    %c0_50 = arith.constant 0 : index
    %175 = vector.load %arg6[%c0_49, %c0_50] : memref<8x72xf32, #tpu.memory_space<vmem>>, vector<8x72xf32>
    %cst_51 = arith.constant dense<0.000000e+00> : vector<8x64xf32>
    %176 = tpu.matmul %175, %174, %cst_51 {dimension_numbers = #tpu.dot_dimension_numbers<[1], [0], [0], [1], [0, 0, 1, 1], [], []>} : vector<8x72xf32>, vector<72x64xf32>, vector<8x64xf32> -> vector<8x64xf32>
    %c0_52 = arith.constant 0 : index
    %c0_53 = arith.constant 0 : index
    %177 = vector.load %arg7[%c0_52, %c0_53] : memref<8x1xf32, #tpu.memory_space<vmem>>, vector<8x1xf32>
    %178 = vector.broadcast %177 : vector<8x1xf32> to vector<8x64xf32>
    %179 = arith.addf %176, %178 : vector<8x64xf32>
    %cst_54 = arith.constant 0.000000e+00 : f32
    %180 = vector.broadcast %cst_54 : f32 to vector<8x64xf32>
    %181 = arith.maximumf %179, %180 : vector<8x64xf32>
    %182 = tpu.iota {dimensions = array<i32: 1>} : vector<1x64xi32>
    %c7_i32_55 = arith.constant 7 : i32
    %183 = vector.broadcast %c7_i32_55 : i32 to vector<1x64xi32>
    %184 = arith.andi %182, %183 : vector<1x64xi32>
    %c0_i32_56 = arith.constant 0 : i32
    %185 = vector.broadcast %c0_i32_56 : i32 to vector<1x64xi32>
    %186 = arith.cmpi ne, %184, %185 : vector<1x64xi32>
    %187 = arith.extui %186 : vector<1x64xi1> to vector<1x64xi32>
    %188 = arith.sitofp %187 : vector<1x64xi32> to vector<1x64xf32>
    %c7_i32_57 = arith.constant 7 : i32
    %189 = vector.broadcast %c7_i32_57 : i32 to vector<1x64xi32>
    %190 = arith.cmpi ne, %184, %189 : vector<1x64xi32>
    %191 = arith.extui %190 : vector<1x64xi1> to vector<1x64xi32>
    %192 = arith.sitofp %191 : vector<1x64xi32> to vector<1x64xf32>
    %cst_58 = arith.constant 0.000000e+00 : f32
    %193 = vector.broadcast %cst_58 : f32 to vector<8x9xf32>
    %194 = vector.extract_strided_slice %181 {offsets = [0, 0], sizes = [8, 55], strides = [1, 1]} : vector<8x64xf32> to vector<8x55xf32>
    %195 = tpu.concatenate %193, %194 in 1 : vector<8x9xf32>, vector<8x55xf32> -> vector<8x64xf32>
    %196 = vector.broadcast %188 : vector<1x64xf32> to vector<8x64xf32>
    %197 = arith.mulf %195, %196 : vector<8x64xf32>
    %cst_59 = arith.constant 0.000000e+00 : f32
    %198 = vector.broadcast %cst_59 : f32 to vector<8x8xf32>
    %199 = vector.extract_strided_slice %181 {offsets = [0, 0], sizes = [8, 56], strides = [1, 1]} : vector<8x64xf32> to vector<8x56xf32>
    %200 = tpu.concatenate %198, %199 in 1 : vector<8x8xf32>, vector<8x56xf32> -> vector<8x64xf32>
    %cst_60 = arith.constant 0.000000e+00 : f32
    %201 = vector.broadcast %cst_60 : f32 to vector<8x7xf32>
    %202 = vector.extract_strided_slice %181 {offsets = [0, 0], sizes = [8, 57], strides = [1, 1]} : vector<8x64xf32> to vector<8x57xf32>
    %203 = tpu.concatenate %201, %202 in 1 : vector<8x7xf32>, vector<8x57xf32> -> vector<8x64xf32>
    %204 = vector.broadcast %192 : vector<1x64xf32> to vector<8x64xf32>
    %205 = arith.mulf %203, %204 : vector<8x64xf32>
    %cst_61 = arith.constant 0.000000e+00 : f32
    %206 = vector.broadcast %cst_61 : f32 to vector<8x1xf32>
    %207 = vector.extract_strided_slice %181 {offsets = [0, 0], sizes = [8, 63], strides = [1, 1]} : vector<8x64xf32> to vector<8x63xf32>
    %208 = tpu.concatenate %206, %207 in 1 : vector<8x1xf32>, vector<8x63xf32> -> vector<8x64xf32>
    %209 = vector.broadcast %188 : vector<1x64xf32> to vector<8x64xf32>
    %210 = arith.mulf %208, %209 : vector<8x64xf32>
    %cst_62 = arith.constant 0.000000e+00 : f32
    %211 = vector.broadcast %cst_62 : f32 to vector<8x1xf32>
    %212 = vector.extract_strided_slice %181 {offsets = [0, 1], sizes = [8, 63], strides = [1, 1]} : vector<8x64xf32> to vector<8x63xf32>
    %213 = tpu.concatenate %212, %211 in 1 : vector<8x63xf32>, vector<8x1xf32> -> vector<8x64xf32>
    %214 = vector.broadcast %192 : vector<1x64xf32> to vector<8x64xf32>
    %215 = arith.mulf %213, %214 : vector<8x64xf32>
    %cst_63 = arith.constant 0.000000e+00 : f32
    %216 = vector.broadcast %cst_63 : f32 to vector<8x7xf32>
    %217 = vector.extract_strided_slice %181 {offsets = [0, 7], sizes = [8, 57], strides = [1, 1]} : vector<8x64xf32> to vector<8x57xf32>
    %218 = tpu.concatenate %217, %216 in 1 : vector<8x57xf32>, vector<8x7xf32> -> vector<8x64xf32>
    %219 = vector.broadcast %188 : vector<1x64xf32> to vector<8x64xf32>
    %220 = arith.mulf %218, %219 : vector<8x64xf32>
    %cst_64 = arith.constant 0.000000e+00 : f32
    %221 = vector.broadcast %cst_64 : f32 to vector<8x8xf32>
    %222 = vector.extract_strided_slice %181 {offsets = [0, 8], sizes = [8, 56], strides = [1, 1]} : vector<8x64xf32> to vector<8x56xf32>
    %223 = tpu.concatenate %222, %221 in 1 : vector<8x56xf32>, vector<8x8xf32> -> vector<8x64xf32>
    %cst_65 = arith.constant 0.000000e+00 : f32
    %224 = vector.broadcast %cst_65 : f32 to vector<8x9xf32>
    %225 = vector.extract_strided_slice %181 {offsets = [0, 9], sizes = [8, 55], strides = [1, 1]} : vector<8x64xf32> to vector<8x55xf32>
    %226 = tpu.concatenate %225, %224 in 1 : vector<8x55xf32>, vector<8x9xf32> -> vector<8x64xf32>
    %227 = vector.broadcast %192 : vector<1x64xf32> to vector<8x64xf32>
    %228 = arith.mulf %226, %227 : vector<8x64xf32>
    %229 = tpu.concatenate %197, %200, %205, %210, %181, %215, %220, %223, %228 in 0 : vector<8x64xf32>, vector<8x64xf32>, vector<8x64xf32>, vector<8x64xf32>, vector<8x64xf32>, vector<8x64xf32>, vector<8x64xf32>, vector<8x64xf32>, vector<8x64xf32> -> vector<72x64xf32>
    %c0_66 = arith.constant 0 : index
    %c0_67 = arith.constant 0 : index
    %230 = vector.load %arg10[%c0_66, %c0_67] : memref<16x72xf32, #tpu.memory_space<vmem>>, vector<16x72xf32>
    %cst_68 = arith.constant dense<0.000000e+00> : vector<16x64xf32>
    %231 = tpu.matmul %230, %229, %cst_68 {dimension_numbers = #tpu.dot_dimension_numbers<[1], [0], [0], [1], [0, 0, 1, 1], [], []>} : vector<16x72xf32>, vector<72x64xf32>, vector<16x64xf32> -> vector<16x64xf32>
    %c0_69 = arith.constant 0 : index
    %c0_70 = arith.constant 0 : index
    %232 = vector.load %arg11[%c0_69, %c0_70] : memref<16x1xf32, #tpu.memory_space<vmem>>, vector<16x1xf32>
    %233 = vector.broadcast %232 : vector<16x1xf32> to vector<16x64xf32>
    %234 = arith.addf %231, %233 : vector<16x64xf32>
    %235 = vector.extract_strided_slice %234 {offsets = [0, 0], sizes = [8, 64], strides = [1, 1]} : vector<16x64xf32> to vector<8x64xf32>
    %236 = vector.extract_strided_slice %234 {offsets = [8, 0], sizes = [8, 64], strides = [1, 1]} : vector<16x64xf32> to vector<8x64xf32>
    %cst_71 = arith.constant 0.000000e+00 : f32
    %237 = vector.broadcast %cst_71 : f32 to vector<8x64xf32>
    %238 = arith.maximumf %236, %237 : vector<8x64xf32>
    %239 = arith.negf %235 : vector<8x64xf32>
    %240 = math.exp %239 : vector<8x64xf32>
    %cst_72 = arith.constant 1.000000e+00 : f32
    %241 = vector.broadcast %cst_72 : f32 to vector<8x64xf32>
    %242 = arith.addf %241, %240 : vector<8x64xf32>
    %243 = arith.divf %241, %242 : vector<8x64xf32>
    %cst_73 = arith.constant 1.000000e+00 : f32
    %244 = vector.broadcast %cst_73 : f32 to vector<8x64xf32>
    %245 = arith.subf %244, %243 : vector<8x64xf32>
    %246 = arith.mulf %238, %245 : vector<8x64xf32>
    %247 = tpu.iota {dimensions = array<i32: 1>} : vector<1x64xi32>
    %c7_i32_74 = arith.constant 7 : i32
    %248 = vector.broadcast %c7_i32_74 : i32 to vector<1x64xi32>
    %249 = arith.andi %247, %248 : vector<1x64xi32>
    %c0_i32_75 = arith.constant 0 : i32
    %250 = vector.broadcast %c0_i32_75 : i32 to vector<1x64xi32>
    %251 = arith.cmpi ne, %249, %250 : vector<1x64xi32>
    %252 = arith.extui %251 : vector<1x64xi1> to vector<1x64xi32>
    %253 = arith.sitofp %252 : vector<1x64xi32> to vector<1x64xf32>
    %c7_i32_76 = arith.constant 7 : i32
    %254 = vector.broadcast %c7_i32_76 : i32 to vector<1x64xi32>
    %255 = arith.cmpi ne, %249, %254 : vector<1x64xi32>
    %256 = arith.extui %255 : vector<1x64xi1> to vector<1x64xi32>
    %257 = arith.sitofp %256 : vector<1x64xi32> to vector<1x64xf32>
    %cst_77 = arith.constant 0.000000e+00 : f32
    %258 = vector.broadcast %cst_77 : f32 to vector<8x9xf32>
    %259 = vector.extract_strided_slice %246 {offsets = [0, 0], sizes = [8, 55], strides = [1, 1]} : vector<8x64xf32> to vector<8x55xf32>
    %260 = tpu.concatenate %258, %259 in 1 : vector<8x9xf32>, vector<8x55xf32> -> vector<8x64xf32>
    %261 = vector.broadcast %253 : vector<1x64xf32> to vector<8x64xf32>
    %262 = arith.mulf %260, %261 : vector<8x64xf32>
    %cst_78 = arith.constant 0.000000e+00 : f32
    %263 = vector.broadcast %cst_78 : f32 to vector<8x8xf32>
    %264 = vector.extract_strided_slice %246 {offsets = [0, 0], sizes = [8, 56], strides = [1, 1]} : vector<8x64xf32> to vector<8x56xf32>
    %265 = tpu.concatenate %263, %264 in 1 : vector<8x8xf32>, vector<8x56xf32> -> vector<8x64xf32>
    %cst_79 = arith.constant 0.000000e+00 : f32
    %266 = vector.broadcast %cst_79 : f32 to vector<8x7xf32>
    %267 = vector.extract_strided_slice %246 {offsets = [0, 0], sizes = [8, 57], strides = [1, 1]} : vector<8x64xf32> to vector<8x57xf32>
    %268 = tpu.concatenate %266, %267 in 1 : vector<8x7xf32>, vector<8x57xf32> -> vector<8x64xf32>
    %269 = vector.broadcast %257 : vector<1x64xf32> to vector<8x64xf32>
    %270 = arith.mulf %268, %269 : vector<8x64xf32>
    %cst_80 = arith.constant 0.000000e+00 : f32
    %271 = vector.broadcast %cst_80 : f32 to vector<8x1xf32>
    %272 = vector.extract_strided_slice %246 {offsets = [0, 0], sizes = [8, 63], strides = [1, 1]} : vector<8x64xf32> to vector<8x63xf32>
    %273 = tpu.concatenate %271, %272 in 1 : vector<8x1xf32>, vector<8x63xf32> -> vector<8x64xf32>
    %274 = vector.broadcast %253 : vector<1x64xf32> to vector<8x64xf32>
    %275 = arith.mulf %273, %274 : vector<8x64xf32>
    %cst_81 = arith.constant 0.000000e+00 : f32
    %276 = vector.broadcast %cst_81 : f32 to vector<8x1xf32>
    %277 = vector.extract_strided_slice %246 {offsets = [0, 1], sizes = [8, 63], strides = [1, 1]} : vector<8x64xf32> to vector<8x63xf32>
    %278 = tpu.concatenate %277, %276 in 1 : vector<8x63xf32>, vector<8x1xf32> -> vector<8x64xf32>
    %279 = vector.broadcast %257 : vector<1x64xf32> to vector<8x64xf32>
    %280 = arith.mulf %278, %279 : vector<8x64xf32>
    %cst_82 = arith.constant 0.000000e+00 : f32
    %281 = vector.broadcast %cst_82 : f32 to vector<8x7xf32>
    %282 = vector.extract_strided_slice %246 {offsets = [0, 7], sizes = [8, 57], strides = [1, 1]} : vector<8x64xf32> to vector<8x57xf32>
    %283 = tpu.concatenate %282, %281 in 1 : vector<8x57xf32>, vector<8x7xf32> -> vector<8x64xf32>
    %284 = vector.broadcast %253 : vector<1x64xf32> to vector<8x64xf32>
    %285 = arith.mulf %283, %284 : vector<8x64xf32>
    %cst_83 = arith.constant 0.000000e+00 : f32
    %286 = vector.broadcast %cst_83 : f32 to vector<8x8xf32>
    %287 = vector.extract_strided_slice %246 {offsets = [0, 8], sizes = [8, 56], strides = [1, 1]} : vector<8x64xf32> to vector<8x56xf32>
    %288 = tpu.concatenate %287, %286 in 1 : vector<8x56xf32>, vector<8x8xf32> -> vector<8x64xf32>
    %cst_84 = arith.constant 0.000000e+00 : f32
    %289 = vector.broadcast %cst_84 : f32 to vector<8x9xf32>
    %290 = vector.extract_strided_slice %246 {offsets = [0, 9], sizes = [8, 55], strides = [1, 1]} : vector<8x64xf32> to vector<8x55xf32>
    %291 = tpu.concatenate %290, %289 in 1 : vector<8x55xf32>, vector<8x9xf32> -> vector<8x64xf32>
    %292 = vector.broadcast %257 : vector<1x64xf32> to vector<8x64xf32>
    %293 = arith.mulf %291, %292 : vector<8x64xf32>
    %294 = tpu.concatenate %262, %265, %270, %275, %246, %280, %285, %288, %293 in 0 : vector<8x64xf32>, vector<8x64xf32>, vector<8x64xf32>, vector<8x64xf32>, vector<8x64xf32>, vector<8x64xf32>, vector<8x64xf32>, vector<8x64xf32>, vector<8x64xf32> -> vector<72x64xf32>
    %c0_85 = arith.constant 0 : index
    %c0_86 = arith.constant 0 : index
    %295 = vector.load %arg14[%c0_85, %c0_86] : memref<8x72xf32, #tpu.memory_space<vmem>>, vector<8x72xf32>
    %cst_87 = arith.constant dense<0.000000e+00> : vector<8x64xf32>
    %296 = tpu.matmul %295, %294, %cst_87 {dimension_numbers = #tpu.dot_dimension_numbers<[1], [0], [0], [1], [0, 0, 1, 1], [], []>} : vector<8x72xf32>, vector<72x64xf32>, vector<8x64xf32> -> vector<8x64xf32>
    %c0_88 = arith.constant 0 : index
    %c0_89 = arith.constant 0 : index
    %297 = vector.load %arg15[%c0_88, %c0_89] : memref<8x1xf32, #tpu.memory_space<vmem>>, vector<8x1xf32>
    %298 = vector.broadcast %297 : vector<8x1xf32> to vector<8x64xf32>
    %299 = arith.addf %296, %298 : vector<8x64xf32>
    %cst_90 = arith.constant 0.000000e+00 : f32
    %300 = vector.broadcast %cst_90 : f32 to vector<8x64xf32>
    %301 = arith.maximumf %299, %300 : vector<8x64xf32>
    %302 = tpu.iota {dimensions = array<i32: 1>} : vector<1x256xi32>
    %c15_i32_91 = arith.constant 15 : i32
    %303 = vector.broadcast %c15_i32_91 : i32 to vector<1x256xi32>
    %304 = arith.andi %302, %303 : vector<1x256xi32>
    %c0_i32_92 = arith.constant 0 : i32
    %305 = vector.broadcast %c0_i32_92 : i32 to vector<1x256xi32>
    %306 = arith.cmpi ne, %304, %305 : vector<1x256xi32>
    %307 = arith.extui %306 : vector<1x256xi1> to vector<1x256xi32>
    %308 = arith.sitofp %307 : vector<1x256xi32> to vector<1x256xf32>
    %c15_i32_93 = arith.constant 15 : i32
    %309 = vector.broadcast %c15_i32_93 : i32 to vector<1x256xi32>
    %310 = arith.cmpi ne, %304, %309 : vector<1x256xi32>
    %311 = arith.extui %310 : vector<1x256xi1> to vector<1x256xi32>
    %312 = arith.sitofp %311 : vector<1x256xi32> to vector<1x256xf32>
    %cst_94 = arith.constant 0.000000e+00 : f32
    %313 = vector.broadcast %cst_94 : f32 to vector<8x17xf32>
    %314 = vector.extract_strided_slice %63 {offsets = [0, 0], sizes = [8, 239], strides = [1, 1]} : vector<8x256xf32> to vector<8x239xf32>
    %315 = tpu.concatenate %313, %314 in 1 : vector<8x17xf32>, vector<8x239xf32> -> vector<8x256xf32>
    %316 = vector.broadcast %308 : vector<1x256xf32> to vector<8x256xf32>
    %317 = arith.mulf %315, %316 : vector<8x256xf32>
    %cst_95 = arith.constant 0.000000e+00 : f32
    %318 = vector.broadcast %cst_95 : f32 to vector<8x16xf32>
    %319 = vector.extract_strided_slice %63 {offsets = [0, 0], sizes = [8, 240], strides = [1, 1]} : vector<8x256xf32> to vector<8x240xf32>
    %320 = tpu.concatenate %318, %319 in 1 : vector<8x16xf32>, vector<8x240xf32> -> vector<8x256xf32>
    %cst_96 = arith.constant 0.000000e+00 : f32
    %321 = vector.broadcast %cst_96 : f32 to vector<8x15xf32>
    %322 = vector.extract_strided_slice %63 {offsets = [0, 0], sizes = [8, 241], strides = [1, 1]} : vector<8x256xf32> to vector<8x241xf32>
    %323 = tpu.concatenate %321, %322 in 1 : vector<8x15xf32>, vector<8x241xf32> -> vector<8x256xf32>
    %324 = vector.broadcast %312 : vector<1x256xf32> to vector<8x256xf32>
    %325 = arith.mulf %323, %324 : vector<8x256xf32>
    %cst_97 = arith.constant 0.000000e+00 : f32
    %326 = vector.broadcast %cst_97 : f32 to vector<8x1xf32>
    %327 = vector.extract_strided_slice %63 {offsets = [0, 0], sizes = [8, 255], strides = [1, 1]} : vector<8x256xf32> to vector<8x255xf32>
    %328 = tpu.concatenate %326, %327 in 1 : vector<8x1xf32>, vector<8x255xf32> -> vector<8x256xf32>
    %329 = vector.broadcast %308 : vector<1x256xf32> to vector<8x256xf32>
    %330 = arith.mulf %328, %329 : vector<8x256xf32>
    %cst_98 = arith.constant 0.000000e+00 : f32
    %331 = vector.broadcast %cst_98 : f32 to vector<8x1xf32>
    %332 = vector.extract_strided_slice %63 {offsets = [0, 1], sizes = [8, 255], strides = [1, 1]} : vector<8x256xf32> to vector<8x255xf32>
    %333 = tpu.concatenate %332, %331 in 1 : vector<8x255xf32>, vector<8x1xf32> -> vector<8x256xf32>
    %334 = vector.broadcast %312 : vector<1x256xf32> to vector<8x256xf32>
    %335 = arith.mulf %333, %334 : vector<8x256xf32>
    %cst_99 = arith.constant 0.000000e+00 : f32
    %336 = vector.broadcast %cst_99 : f32 to vector<8x15xf32>
    %337 = vector.extract_strided_slice %63 {offsets = [0, 15], sizes = [8, 241], strides = [1, 1]} : vector<8x256xf32> to vector<8x241xf32>
    %338 = tpu.concatenate %337, %336 in 1 : vector<8x241xf32>, vector<8x15xf32> -> vector<8x256xf32>
    %339 = vector.broadcast %308 : vector<1x256xf32> to vector<8x256xf32>
    %340 = arith.mulf %338, %339 : vector<8x256xf32>
    %cst_100 = arith.constant 0.000000e+00 : f32
    %341 = vector.broadcast %cst_100 : f32 to vector<8x16xf32>
    %342 = vector.extract_strided_slice %63 {offsets = [0, 16], sizes = [8, 240], strides = [1, 1]} : vector<8x256xf32> to vector<8x240xf32>
    %343 = tpu.concatenate %342, %341 in 1 : vector<8x240xf32>, vector<8x16xf32> -> vector<8x256xf32>
    %cst_101 = arith.constant 0.000000e+00 : f32
    %344 = vector.broadcast %cst_101 : f32 to vector<8x17xf32>
    %345 = vector.extract_strided_slice %63 {offsets = [0, 17], sizes = [8, 239], strides = [1, 1]} : vector<8x256xf32> to vector<8x239xf32>
    %346 = tpu.concatenate %345, %344 in 1 : vector<8x239xf32>, vector<8x17xf32> -> vector<8x256xf32>
    %347 = vector.broadcast %312 : vector<1x256xf32> to vector<8x256xf32>
    %348 = arith.mulf %346, %347 : vector<8x256xf32>
    %349 = tpu.concatenate %317, %320, %325, %330, %63, %335, %340, %343, %348 in 0 : vector<8x256xf32>, vector<8x256xf32>, vector<8x256xf32>, vector<8x256xf32>, vector<8x256xf32>, vector<8x256xf32>, vector<8x256xf32>, vector<8x256xf32>, vector<8x256xf32> -> vector<72x256xf32>
    %c0_102 = arith.constant 0 : index
    %c0_103 = arith.constant 0 : index
    %350 = vector.load %arg8[%c0_102, %c0_103] : memref<16x72xf32, #tpu.memory_space<vmem>>, vector<16x72xf32>
    %cst_104 = arith.constant dense<0.000000e+00> : vector<16x256xf32>
    %351 = tpu.matmul %350, %349, %cst_104 {dimension_numbers = #tpu.dot_dimension_numbers<[1], [0], [0], [1], [0, 0, 1, 1], [], []>} : vector<16x72xf32>, vector<72x256xf32>, vector<16x256xf32> -> vector<16x256xf32>
    %c0_105 = arith.constant 0 : index
    %c0_106 = arith.constant 0 : index
    %352 = vector.load %arg9[%c0_105, %c0_106] : memref<16x1xf32, #tpu.memory_space<vmem>>, vector<16x1xf32>
    %353 = vector.broadcast %352 : vector<16x1xf32> to vector<16x256xf32>
    %354 = arith.addf %351, %353 : vector<16x256xf32>
    %355 = vector.extract_strided_slice %354 {offsets = [0, 0], sizes = [8, 256], strides = [1, 1]} : vector<16x256xf32> to vector<8x256xf32>
    %356 = vector.extract_strided_slice %354 {offsets = [8, 0], sizes = [8, 256], strides = [1, 1]} : vector<16x256xf32> to vector<8x256xf32>
    %cst_107 = arith.constant 0.000000e+00 : f32
    %357 = vector.broadcast %cst_107 : f32 to vector<8x256xf32>
    %358 = arith.maximumf %356, %357 : vector<8x256xf32>
    %359 = arith.negf %355 : vector<8x256xf32>
    %360 = math.exp %359 : vector<8x256xf32>
    %cst_108 = arith.constant 1.000000e+00 : f32
    %361 = vector.broadcast %cst_108 : f32 to vector<8x256xf32>
    %362 = arith.addf %361, %360 : vector<8x256xf32>
    %363 = arith.divf %361, %362 : vector<8x256xf32>
    %cst_109 = arith.constant 1.000000e+00 : f32
    %364 = vector.broadcast %cst_109 : f32 to vector<8x256xf32>
    %365 = arith.subf %364, %363 : vector<8x256xf32>
    %366 = arith.mulf %358, %365 : vector<8x256xf32>
    %367 = tpu.iota {dimensions = array<i32: 0>} : vector<8x16xi32>
    %368 = tpu.iota {dimensions = array<i32: 1>} : vector<8x16xi32>
    %c2_i32_110 = arith.constant 2 : i32
    %369 = vector.broadcast %c2_i32_110 : i32 to vector<8x16xi32>
    %370 = arith.muli %369, %367 : vector<8x16xi32>
    %371 = arith.cmpi eq, %368, %370 : vector<8x16xi32>
    %c2_i32_111 = arith.constant 2 : i32
    %372 = vector.broadcast %c2_i32_111 : i32 to vector<8x16xi32>
    %373 = arith.muli %372, %367 : vector<8x16xi32>
    %c1_i32_112 = arith.constant 1 : i32
    %374 = vector.broadcast %c1_i32_112 : i32 to vector<8x16xi32>
    %375 = arith.addi %373, %374 : vector<8x16xi32>
    %376 = arith.cmpi eq, %368, %375 : vector<8x16xi32>
    %377 = arith.ori %371, %376 : vector<8x16xi1>
    %378 = arith.extui %377 : vector<8x16xi1> to vector<8x16xi32>
    %379 = arith.sitofp %378 : vector<8x16xi32> to vector<8x16xf32>
    %380 = vector.extract_strided_slice %301 {offsets = [0, 0], sizes = [8, 8], strides = [1, 1]} : vector<8x64xf32> to vector<8x8xf32>
    %cst_113 = arith.constant dense<0.000000e+00> : vector<8x16xf32>
    %381 = tpu.matmul %380, %379, %cst_113 {dimension_numbers = #tpu.dot_dimension_numbers<[1], [0], [0], [1], [0, 0, 1, 1], [], []>} : vector<8x8xf32>, vector<8x16xf32>, vector<8x16xf32> -> vector<8x16xf32>
    %382 = vector.extract_strided_slice %301 {offsets = [0, 8], sizes = [8, 8], strides = [1, 1]} : vector<8x64xf32> to vector<8x8xf32>
    %cst_114 = arith.constant dense<0.000000e+00> : vector<8x16xf32>
    %383 = tpu.matmul %382, %379, %cst_114 {dimension_numbers = #tpu.dot_dimension_numbers<[1], [0], [0], [1], [0, 0, 1, 1], [], []>} : vector<8x8xf32>, vector<8x16xf32>, vector<8x16xf32> -> vector<8x16xf32>
    %384 = vector.extract_strided_slice %301 {offsets = [0, 16], sizes = [8, 8], strides = [1, 1]} : vector<8x64xf32> to vector<8x8xf32>
    %cst_115 = arith.constant dense<0.000000e+00> : vector<8x16xf32>
    %385 = tpu.matmul %384, %379, %cst_115 {dimension_numbers = #tpu.dot_dimension_numbers<[1], [0], [0], [1], [0, 0, 1, 1], [], []>} : vector<8x8xf32>, vector<8x16xf32>, vector<8x16xf32> -> vector<8x16xf32>
    %386 = vector.extract_strided_slice %301 {offsets = [0, 24], sizes = [8, 8], strides = [1, 1]} : vector<8x64xf32> to vector<8x8xf32>
    %cst_116 = arith.constant dense<0.000000e+00> : vector<8x16xf32>
    %387 = tpu.matmul %386, %379, %cst_116 {dimension_numbers = #tpu.dot_dimension_numbers<[1], [0], [0], [1], [0, 0, 1, 1], [], []>} : vector<8x8xf32>, vector<8x16xf32>, vector<8x16xf32> -> vector<8x16xf32>
    %388 = vector.extract_strided_slice %301 {offsets = [0, 32], sizes = [8, 8], strides = [1, 1]} : vector<8x64xf32> to vector<8x8xf32>
    %cst_117 = arith.constant dense<0.000000e+00> : vector<8x16xf32>
    %389 = tpu.matmul %388, %379, %cst_117 {dimension_numbers = #tpu.dot_dimension_numbers<[1], [0], [0], [1], [0, 0, 1, 1], [], []>} : vector<8x8xf32>, vector<8x16xf32>, vector<8x16xf32> -> vector<8x16xf32>
    %390 = vector.extract_strided_slice %301 {offsets = [0, 40], sizes = [8, 8], strides = [1, 1]} : vector<8x64xf32> to vector<8x8xf32>
    %cst_118 = arith.constant dense<0.000000e+00> : vector<8x16xf32>
    %391 = tpu.matmul %390, %379, %cst_118 {dimension_numbers = #tpu.dot_dimension_numbers<[1], [0], [0], [1], [0, 0, 1, 1], [], []>} : vector<8x8xf32>, vector<8x16xf32>, vector<8x16xf32> -> vector<8x16xf32>
    %392 = vector.extract_strided_slice %301 {offsets = [0, 48], sizes = [8, 8], strides = [1, 1]} : vector<8x64xf32> to vector<8x8xf32>
    %cst_119 = arith.constant dense<0.000000e+00> : vector<8x16xf32>
    %393 = tpu.matmul %392, %379, %cst_119 {dimension_numbers = #tpu.dot_dimension_numbers<[1], [0], [0], [1], [0, 0, 1, 1], [], []>} : vector<8x8xf32>, vector<8x16xf32>, vector<8x16xf32> -> vector<8x16xf32>
    %394 = vector.extract_strided_slice %301 {offsets = [0, 56], sizes = [8, 8], strides = [1, 1]} : vector<8x64xf32> to vector<8x8xf32>
    %cst_120 = arith.constant dense<0.000000e+00> : vector<8x16xf32>
    %395 = tpu.matmul %394, %379, %cst_120 {dimension_numbers = #tpu.dot_dimension_numbers<[1], [0], [0], [1], [0, 0, 1, 1], [], []>} : vector<8x8xf32>, vector<8x16xf32>, vector<8x16xf32> -> vector<8x16xf32>
    %396 = tpu.concatenate %381, %381, %383, %383, %385, %385, %387, %387, %389, %389, %391, %391, %393, %393, %395, %395 in 1 : vector<8x16xf32>, vector<8x16xf32>, vector<8x16xf32>, vector<8x16xf32>, vector<8x16xf32>, vector<8x16xf32>, vector<8x16xf32>, vector<8x16xf32>, vector<8x16xf32>, vector<8x16xf32>, vector<8x16xf32>, vector<8x16xf32>, vector<8x16xf32>, vector<8x16xf32>, vector<8x16xf32>, vector<8x16xf32> -> vector<8x256xf32>
    %397 = arith.addf %396, %366 : vector<8x256xf32>
    %398 = tpu.iota {dimensions = array<i32: 1>} : vector<1x256xi32>
    %c15_i32_121 = arith.constant 15 : i32
    %399 = vector.broadcast %c15_i32_121 : i32 to vector<1x256xi32>
    %400 = arith.andi %398, %399 : vector<1x256xi32>
    %c0_i32_122 = arith.constant 0 : i32
    %401 = vector.broadcast %c0_i32_122 : i32 to vector<1x256xi32>
    %402 = arith.cmpi ne, %400, %401 : vector<1x256xi32>
    %403 = arith.extui %402 : vector<1x256xi1> to vector<1x256xi32>
    %404 = arith.sitofp %403 : vector<1x256xi32> to vector<1x256xf32>
    %c15_i32_123 = arith.constant 15 : i32
    %405 = vector.broadcast %c15_i32_123 : i32 to vector<1x256xi32>
    %406 = arith.cmpi ne, %400, %405 : vector<1x256xi32>
    %407 = arith.extui %406 : vector<1x256xi1> to vector<1x256xi32>
    %408 = arith.sitofp %407 : vector<1x256xi32> to vector<1x256xf32>
    %cst_124 = arith.constant 0.000000e+00 : f32
    %409 = vector.broadcast %cst_124 : f32 to vector<8x17xf32>
    %410 = vector.extract_strided_slice %397 {offsets = [0, 0], sizes = [8, 239], strides = [1, 1]} : vector<8x256xf32> to vector<8x239xf32>
    %411 = tpu.concatenate %409, %410 in 1 : vector<8x17xf32>, vector<8x239xf32> -> vector<8x256xf32>
    %412 = vector.broadcast %404 : vector<1x256xf32> to vector<8x256xf32>
    %413 = arith.mulf %411, %412 : vector<8x256xf32>
    %cst_125 = arith.constant 0.000000e+00 : f32
    %414 = vector.broadcast %cst_125 : f32 to vector<8x16xf32>
    %415 = vector.extract_strided_slice %397 {offsets = [0, 0], sizes = [8, 240], strides = [1, 1]} : vector<8x256xf32> to vector<8x240xf32>
    %416 = tpu.concatenate %414, %415 in 1 : vector<8x16xf32>, vector<8x240xf32> -> vector<8x256xf32>
    %cst_126 = arith.constant 0.000000e+00 : f32
    %417 = vector.broadcast %cst_126 : f32 to vector<8x15xf32>
    %418 = vector.extract_strided_slice %397 {offsets = [0, 0], sizes = [8, 241], strides = [1, 1]} : vector<8x256xf32> to vector<8x241xf32>
    %419 = tpu.concatenate %417, %418 in 1 : vector<8x15xf32>, vector<8x241xf32> -> vector<8x256xf32>
    %420 = vector.broadcast %408 : vector<1x256xf32> to vector<8x256xf32>
    %421 = arith.mulf %419, %420 : vector<8x256xf32>
    %cst_127 = arith.constant 0.000000e+00 : f32
    %422 = vector.broadcast %cst_127 : f32 to vector<8x1xf32>
    %423 = vector.extract_strided_slice %397 {offsets = [0, 0], sizes = [8, 255], strides = [1, 1]} : vector<8x256xf32> to vector<8x255xf32>
    %424 = tpu.concatenate %422, %423 in 1 : vector<8x1xf32>, vector<8x255xf32> -> vector<8x256xf32>
    %425 = vector.broadcast %404 : vector<1x256xf32> to vector<8x256xf32>
    %426 = arith.mulf %424, %425 : vector<8x256xf32>
    %cst_128 = arith.constant 0.000000e+00 : f32
    %427 = vector.broadcast %cst_128 : f32 to vector<8x1xf32>
    %428 = vector.extract_strided_slice %397 {offsets = [0, 1], sizes = [8, 255], strides = [1, 1]} : vector<8x256xf32> to vector<8x255xf32>
    %429 = tpu.concatenate %428, %427 in 1 : vector<8x255xf32>, vector<8x1xf32> -> vector<8x256xf32>
    %430 = vector.broadcast %408 : vector<1x256xf32> to vector<8x256xf32>
    %431 = arith.mulf %429, %430 : vector<8x256xf32>
    %cst_129 = arith.constant 0.000000e+00 : f32
    %432 = vector.broadcast %cst_129 : f32 to vector<8x15xf32>
    %433 = vector.extract_strided_slice %397 {offsets = [0, 15], sizes = [8, 241], strides = [1, 1]} : vector<8x256xf32> to vector<8x241xf32>
    %434 = tpu.concatenate %433, %432 in 1 : vector<8x241xf32>, vector<8x15xf32> -> vector<8x256xf32>
    %435 = vector.broadcast %404 : vector<1x256xf32> to vector<8x256xf32>
    %436 = arith.mulf %434, %435 : vector<8x256xf32>
    %cst_130 = arith.constant 0.000000e+00 : f32
    %437 = vector.broadcast %cst_130 : f32 to vector<8x16xf32>
    %438 = vector.extract_strided_slice %397 {offsets = [0, 16], sizes = [8, 240], strides = [1, 1]} : vector<8x256xf32> to vector<8x240xf32>
    %439 = tpu.concatenate %438, %437 in 1 : vector<8x240xf32>, vector<8x16xf32> -> vector<8x256xf32>
    %cst_131 = arith.constant 0.000000e+00 : f32
    %440 = vector.broadcast %cst_131 : f32 to vector<8x17xf32>
    %441 = vector.extract_strided_slice %397 {offsets = [0, 17], sizes = [8, 239], strides = [1, 1]} : vector<8x256xf32> to vector<8x239xf32>
    %442 = tpu.concatenate %441, %440 in 1 : vector<8x239xf32>, vector<8x17xf32> -> vector<8x256xf32>
    %443 = vector.broadcast %408 : vector<1x256xf32> to vector<8x256xf32>
    %444 = arith.mulf %442, %443 : vector<8x256xf32>
    %445 = tpu.concatenate %413, %416, %421, %426, %397, %431, %436, %439, %444 in 0 : vector<8x256xf32>, vector<8x256xf32>, vector<8x256xf32>, vector<8x256xf32>, vector<8x256xf32>, vector<8x256xf32>, vector<8x256xf32>, vector<8x256xf32>, vector<8x256xf32> -> vector<72x256xf32>
    %c0_132 = arith.constant 0 : index
    %c0_133 = arith.constant 0 : index
    %446 = vector.load %arg12[%c0_132, %c0_133] : memref<8x72xf32, #tpu.memory_space<vmem>>, vector<8x72xf32>
    %cst_134 = arith.constant dense<0.000000e+00> : vector<8x256xf32>
    %447 = tpu.matmul %446, %445, %cst_134 {dimension_numbers = #tpu.dot_dimension_numbers<[1], [0], [0], [1], [0, 0, 1, 1], [], []>} : vector<8x72xf32>, vector<72x256xf32>, vector<8x256xf32> -> vector<8x256xf32>
    %c0_135 = arith.constant 0 : index
    %c0_136 = arith.constant 0 : index
    %448 = vector.load %arg13[%c0_135, %c0_136] : memref<8x1xf32, #tpu.memory_space<vmem>>, vector<8x1xf32>
    %449 = vector.broadcast %448 : vector<8x1xf32> to vector<8x256xf32>
    %450 = arith.addf %447, %449 : vector<8x256xf32>
    %cst_137 = arith.constant 0.000000e+00 : f32
    %451 = vector.broadcast %cst_137 : f32 to vector<8x256xf32>
    %452 = arith.maximumf %450, %451 : vector<8x256xf32>
    %c0_138 = arith.constant 0 : index
    %c0_139 = arith.constant 0 : index
    %453 = vector.load %arg16[%c0_138, %c0_139] : memref<3x8xf32, #tpu.memory_space<vmem>>, vector<3x8xf32>
    %cst_140 = arith.constant dense<0.000000e+00> : vector<3x256xf32>
    %454 = tpu.matmul %453, %452, %cst_140 {dimension_numbers = #tpu.dot_dimension_numbers<[1], [0], [0], [1], [0, 0, 1, 1], [], []>} : vector<3x8xf32>, vector<8x256xf32>, vector<3x256xf32> -> vector<3x256xf32>
    %c0_141 = arith.constant 0 : index
    %c0_142 = arith.constant 0 : index
    %455 = vector.load %arg17[%c0_141, %c0_142] : memref<3x1xf32, #tpu.memory_space<vmem>>, vector<3x1xf32>
    %456 = vector.broadcast %455 : vector<3x1xf32> to vector<3x256xf32>
    %457 = arith.addf %454, %456 : vector<3x256xf32>
    %c0_143 = arith.constant 0 : index
    %c0_144 = arith.constant 0 : index
    %c0_145 = arith.constant 0 : index
    %458 = vector.load %arg18[%c0_143, %c0_144, %c0_145] : memref<1x3x256xf32, #tpu.memory_space<vmem>>, vector<1x3x256xf32>
    %459 = vector.shape_cast %458 : vector<1x3x256xf32> to vector<3x256xf32>
    %460 = vector.shape_cast %457 : vector<3x256xf32> to vector<1x3x256xf32>
    tpu.vector_store %arg18[%c0_143, %c0_144, %c0_145], %460 {strides = array<i32>} : memref<1x3x256xf32, #tpu.memory_space<vmem>>, vector<1x3x256xf32>,
    return
  }
  func.func @transform_0(%arg0: i32) -> (i32, i32, i32) {
    %c0_i32 = arith.constant 0 : i32
    %c0_i32_0 = arith.constant 0 : i32
    %c0_i32_1 = arith.constant 0 : i32
    return %arg0, %c0_i32, %c0_i32_0 : i32, i32, i32
  }
  func.func @transform_1(%arg0: i32) -> (i32, i32) {
    %c0_i32 = arith.constant 0 : i32
    %c0_i32_0 = arith.constant 0 : i32
    %c0_i32_1 = arith.constant 0 : i32
    return %c0_i32, %c0_i32_0 : i32, i32
  }
  func.func @transform_2(%arg0: i32) -> (i32, i32) {
    %c0_i32 = arith.constant 0 : i32
    %c0_i32_0 = arith.constant 0 : i32
    %c0_i32_1 = arith.constant 0 : i32
    return %c0_i32, %c0_i32_0 : i32, i32
  }
  func.func @transform_3(%arg0: i32) -> (i32, i32) {
    %c0_i32 = arith.constant 0 : i32
    %c0_i32_0 = arith.constant 0 : i32
    %c0_i32_1 = arith.constant 0 : i32
    return %c0_i32, %c0_i32_0 : i32, i32
  }
  func.func @transform_4(%arg0: i32) -> (i32, i32) {
    %c0_i32 = arith.constant 0 : i32
    %c0_i32_0 = arith.constant 0 : i32
    %c0_i32_1 = arith.constant 0 : i32
    return %c0_i32, %c0_i32_0 : i32, i32
  }
  func.func @transform_5(%arg0: i32) -> (i32, i32) {
    %c0_i32 = arith.constant 0 : i32
    %c0_i32_0 = arith.constant 0 : i32
    %c0_i32_1 = arith.constant 0 : i32
    return %c0_i32, %c0_i32_0 : i32, i32
  }
  func.func @transform_6(%arg0: i32) -> (i32, i32) {
    %c0_i32 = arith.constant 0 : i32
    %c0_i32_0 = arith.constant 0 : i32
    %c0_i32_1 = arith.constant 0 : i32
    return %c0_i32, %c0_i32_0 : i32, i32
  }
  func.func @transform_7(%arg0: i32) -> (i32, i32) {
    %c0_i32 = arith.constant 0 : i32
    %c0_i32_0 = arith.constant 0 : i32
    %c0_i32_1 = arith.constant 0 : i32
    return %c0_i32, %c0_i32_0 : i32, i32
  }
  func.func @transform_8(%arg0: i32) -> (i32, i32) {
    %c0_i32 = arith.constant 0 : i32
    %c0_i32_0 = arith.constant 0 : i32
    %c0_i32_1 = arith.constant 0 : i32
    return %c0_i32, %c0_i32_0 : i32, i32
  }
  func.func @transform_9(%arg0: i32) -> (i32, i32) {
    %c0_i32 = arith.constant 0 : i32
    %c0_i32_0 = arith.constant 0 : i32
    %c0_i32_1 = arith.constant 0 : i32
    return %c0_i32, %c0_i32_0 : i32, i32
  }
  func.func @transform_10(%arg0: i32) -> (i32, i32) {
    %c0_i32 = arith.constant 0 : i32
    %c0_i32_0 = arith.constant 0 : i32
    %c0_i32_1 = arith.constant 0 : i32
    return %c0_i32, %c0_i32_0 : i32, i32
  }
  func.func @transform_11(%arg0: i32) -> (i32, i32) {
    %c0_i32 = arith.constant 0 : i32
    %c0_i32_0 = arith.constant 0 : i32
    %c0_i32_1 = arith.constant 0 : i32
    return %c0_i32, %c0_i32_0 : i32, i32
  }
  func.func @transform_12(%arg0: i32) -> (i32, i32) {
    %c0_i32 = arith.constant 0 : i32
    %c0_i32_0 = arith.constant 0 : i32
    %c0_i32_1 = arith.constant 0 : i32
    return %c0_i32, %c0_i32_0 : i32, i32
  }
  func.func @transform_13(%arg0: i32) -> (i32, i32) {
    %c0_i32 = arith.constant 0 : i32
    %c0_i32_0 = arith.constant 0 : i32
    %c0_i32_1 = arith.constant 0 : i32
    return %c0_i32, %c0_i32_0 : i32, i32
  }
  func.func @transform_14(%arg0: i32) -> (i32, i32) {
    %c0_i32 = arith.constant 0 : i32
    %c0_i32_0 = arith.constant 0 : i32
    %c0_i32_1 = arith.constant 0 : i32
    return %c0_i32, %c0_i32_0 : i32, i32
  }
  func.func @transform_15(%arg0: i32) -> (i32, i32) {
    %c0_i32 = arith.constant 0 : i32
    %c0_i32_0 = arith.constant 0 : i32
    %c0_i32_1 = arith.constant 0 : i32
    return %c0_i32, %c0_i32_0 : i32, i32
  }
  func.func @transform_16(%arg0: i32) -> (i32, i32) {
    %c0_i32 = arith.constant 0 : i32
    %c0_i32_0 = arith.constant 0 : i32
    %c0_i32_1 = arith.constant 0 : i32
    return %c0_i32, %c0_i32_0 : i32, i32
  }
  func.func @transform_17(%arg0: i32) -> (i32, i32, i32) {
    %c0_i32 = arith.constant 0 : i32
    %c0_i32_0 = arith.constant 0 : i32
    %c0_i32_1 = arith.constant 0 : i32
    return %arg0, %c0_i32, %c0_i32_0 : i32, i32, i32
  }
}

</mosaic_0001>

<bundles_post_ra>
// kernel: tpu_custom_call.1
= control target key start
LH: loop header
LB: loop body
LE: loop exit
PB: predicated region body
PF: predicated region fallthrough
CT: control target
= control target key end

     0   :  { %s4214_s24 = smov 0   ;;  %s4968_s0 = inlined_call_operand.vmem [shape: f32[2,4,256], index: 0, kind: input, shape index: {}]   ;;  %s4969_s1 = inlined_call_operand.vmem [shape: f32[8,4], index: 1, kind: input, shape index: {}]   ;;  %s4970_s2 = inlined_call_operand.vmem [shape: f32[8,1], index: 2, kind: input, shape index: {}]   ;;  %s4971_s3 = inlined_call_operand.vmem [shape: f32[8,72], index: 3, kind: input, shape index: {}]   ;;  %s4972_s4 = inlined_call_operand.vmem [shape: f32[8,1], index: 4, kind: input, shape index: {}]   ;;  %s4973_s5 = inlined_call_operand.vmem [shape: f32[8,72], index: 5, kind: input, shape index: {}]   ;;  %s4974_s6 = inlined_call_operand.vmem [shape: f32[8,1], index: 6, kind: input, shape index: {}]   ;;  %s4975_s7 = inlined_call_operand.vmem [shape: f32[16,72], index: 7, kind: input, shape index: {}]   ;;  %s4976_s8 = inlined_call_operand.vmem [shape: f32[16,1], index: 8, kind: input, shape index: {}]   ;;  %s4977_s9 = inlined_call_operand.vmem [shape: f32[16,72], index: 9, kind: input, shape index: {}]   ;;  %s4978_s10 = inlined_call_operand.vmem [shape: f32[16,1], index: 10, kind: input, shape index: {}]   ;;  %s4979_s11 = inlined_call_operand.vmem [shape: f32[8,72], index: 11, kind: input, shape index: {}]   ;;  %s4980_s12 = inlined_call_operand.vmem [shape: f32[8,1], index: 12, kind: input, shape index: {}]   ;;  %s4981_s13 = inlined_call_operand.vmem [shape: f32[8,72], index: 13, kind: input, shape index: {}]   ;;  %s4982_s14 = inlined_call_operand.vmem [shape: f32[8,1], index: 14, kind: input, shape index: {}]   ;;  %s4983_s15 = inlined_call_operand.vmem [shape: f32[3,8], index: 15, kind: input, shape index: {}]   ;;  %s4984_s16 = inlined_call_operand.vmem [shape: f32[3,1], index: 16, kind: input, shape index: {}]   ;;  %s4985_s17 = inlined_call_operand.vmem [shape: f32[2,3,256], index: 17, kind: output, shape index: {}]  }
   0x1   :  { %5018 = sst [smem:[#allocation2_spill]] %s4968_s0 }
   0x2   :  { %5019 = sst [smem:[#allocation3_spill]] %s4969_s1 }
   0x3   :  { %5020 = sst [smem:[#allocation4_spill]] %s4970_s2 }
   0x4   :  { %5021 = sst [smem:[#allocation5_spill]] %s4971_s3 }
   0x5 LB: > { %s3604_s25 = sadd.s32 4294967295, %s4093_s24   ;;  %p3608_p0 = scmp.ge.s32.totalorder %s4093_s24, 1  ;;  %s4093_s24 = sphi %s4214_s24, %s27_s24  }
   0x6   : > { %p487_p1 = scmp.lt.s32.totalorder %s4093_s24, 3 }
   0x8   : > { %p488_p2 = pnand %p3608_p0, %p487_p1 }
   0x9   : > { %p539_p3 = scmp.lt.s32.totalorder (!%p488_p2), %s3604_s25, 1  ;;  %s5022_s2 = sld [smem:[#allocation4_spill]] (!%p488_p2) }
   0xa   : > { %491 = sbr.rel (%p488_p2) target bundleno = 3176 (0xc68), region = 88  ;;  %s5023_s30 = sld [smem:[#allocation2_spill]] (!%p488_p2) }
   0xb   : > { %s5024_s20 = sld [smem:[#allocation3_spill]] (!%p488_p2)  ;;  %s5008_s21 = smov (!%p488_p2), 113  }
   0xc   : > { %s5010_s22 = smov (!%p488_p2), 111   ;;  %s5014_s23 = smov (!%p488_p2), 127  }
   0xd   : > { %s4996_s26 = smov (!%p488_p2), 112   ;;  %s5016_s27 = smov (!%p488_p2), 1  }
   0xe   : > { %s5006_s29 = smov (!%p488_p2), 15   ;;  %s5000_s0 = smov (!%p488_p2), 17  }
   0xf   : > { %v4095_v0 = vmov 0.0   ;;  %v4096_v1 = vmov 0   ;;  %v551_v2 = vld [vmem:[%s5022_s2] sm:$0xff]  ;;  %s5071_s25 = smov (!%p539_p3, %s3604_s25), 1  ;;  %vm563_vm0 = vcmask 1043456   ;;  %vm559_vm1 = vcmask 31744  }
  0x10   : > { %632 = vmatprep.mubr.f32.mxu0 %v4095_v0  ;;  %4072 = vset.pattern.permute.xlu0 %v4096_v1  ;;  %s4986_s28 = sshll.u32 %s5071_s25, 3  ;;  %v745_v13 = vld [vmem:[%s4972_s4] sm:$0xff]  ;;  %v641_v14 = vlaneseq  ;;  %vm737_vm4 = vcmask 908288   ;;  %vm717_vm7 = vcmask 924672   ;;  %vm728_vm8 = vcmask 916480   ;;  %s5027_s3 = sld [smem:[#allocation5_spill]] }
  0x11   : > { %554 = vperm.xlu0 %4072, %v551_v2   ;;  %819 = vmatprep.mubr.f32.mxu1 %v4095_v0  ;;  %s543_s18 = scalar_lea.vmem %s5023_s30, %s4986_s28  ;;  %v550_v5 = vld [vmem:[%s5024_s20] sm:$0xff]  ;;  %s4998_s30 = smov 16   ;;  %vm706_vm9 = vcmask 1039360   ;;  %vm695_vm10 = vcmask 7168   ;;  %vm5005_vm11 = vcmask 121856   ;;  %vm4991_vm12 = vcmask 138240  }
  0x12   : > { %4073 = vset.pattern.permute.xlu1 %v4096_v1  ;;  %v549_v3 = vld [vmem:[%s543_s18] sm:$0xff]  ;;  %v4279_v15 = vand.u32 127, %v641_v14  ;;  %vm5004_vm13 = vcmask 130048   ;;  %vm751_vm15 = vcmask 588800   ;;  %s4987_s18 = smov 64   ;;  %s4989_s19 = smov 96  }
  0x13   : > { %v558_v4 = vcombine.high %v549_v3, %v549_v3  ;;  %vm4322_vm14 = vmneg %vm5004_vm13  ;;  %s4994_s1 = smov 32   ;;  %s4110_s20 = smov 8  }
  0x14   : > { %v643_v16 = vadd.s32 128, %v4279_v15  ;;  %v644_v20 = vand.u32 15, %v4279_v15  ;;  %s4111_s28 = smov 24   ;;  %s5053_s2 = smov 32  }
  0x15   : > { %3613 = vmatprep.subr.msk.mxu0 %vm563_vm0, %v558_v4  ;;  %v4337_v4 = vshrl.u32 %v641_v14, 7 }
  0x16   : > { %3614 = vmatpush1.msk.msra.mxu0 %vm563_vm0, %v549_v3  ;;  %v645_v19 = vand.u32 15, %v643_v16  ;;  %vm652_vm3 = vcmp.ne.s32.totalorder %v644_v20, 15  ;;  %vm646_vm6 = vcmp.ne.s32.totalorder %v644_v20, 0  ;;  %v744_v3 = vld [vmem:[%s5027_s3] sm:$0xff]  ;;  %s5054_s3 = smov 48  }
  0x17   : > { %3615 = vmatmul.mubr.msk.f32.vlgmr.msra.gmra.mxu0 %vm559_vm1, %v550_v5  ;;  %3820 = vmatprep.subr.mxu0 %v4095_v0  ;;  %v4287_v24 = vsel %vm652_vm3, 1.0, %v4095_v0  ;;  %v4300_v37 = vsel %vm646_vm6, 1.0, %v4095_v0  ;;  %v831_v5 = vmul.u32 2, %v4279_v15  ;;  %vm2041_vm6 = vcmask 64512  }
  0x18   : > { %vm653_vm2 = vcmp.ne.s32.totalorder %v645_v19, 15  ;;  %vm647_vm5 = vcmp.ne.s32.totalorder %v645_v19, 0 }
  0x19   : > { %v4284_v23 = vsel %vm653_vm2, 1.0, %v4095_v0  ;;  %v4294_v31 = vsel %vm647_vm5, 1.0, %v4095_v0  ;;  %vm4350_vm1 = vcmp.eq.s32.totalorder %v4337_v4, %v831_v5  ;;  %vm4106_vm2 = vmmov 0  }
  0x1a   : > { %3824 = vmatprep.mubr.msk.f32.mxu0 %vm4106_vm2, %v4095_v0 }
  0x8c   : > { %v555_v6 = vpop.permute.xlu0 %554 }
  0xd7   : > { %v634_v7 = vpop.f32.mrf.mxu0 }
  0xd8   : > { %v635_v8 = vadd.f32 %v634_v7, %v555_v6 }
  0xd9   : > { %v636_v10 = vpop.f32.mrf.mxu0 }
  0xda   : > { %v4239_v9 = vmax.f32 %v635_v8, 0.0  ;;  %v637_v11 = vadd.f32 %v636_v10, %v555_v6  ;;  %v830_v6 = vadd.s32 8, %v4337_v4  ;;  %v4105_v8 = vmov 1.0  }
  0xdb   : > { %v838_v10 = vadd.s32 1, %v831_v5 }
  0xdc   : > { %713 = vrot.lane.b32.xlu0 %v4239_v9, %s5008_s21  ;;  %733 = vrot.lane.b32.xlu1 %v4239_v9, %s5010_s22  ;;  %v4249_v12 = vmax.f32 %v637_v11, 0.0  ;;  %vm4341_vm0 = vcmp.eq.s32.totalorder %v830_v6, %v831_v5 }
  0xdd   : > { %3821 = vmatpush3.msk.msra.mxu0 %vm4341_vm0, %v4105_v8  ;;  %vm4362_vm3 = vcmp.eq.s32.totalorder %v830_v6, %v838_v10  ;;  %vm4370_vm5 = vcmp.eq.s32.totalorder %v4337_v4, %v838_v10 }
  0xde   : > { %3822 = vmatprep.subr.mxu0 %v4095_v0 }
  0xdf   : > { %3823 = vmatpush3.msk.msra.mxu0 %vm4350_vm1, %v4105_v8 }
  0xe0   : > { %702 = vrot.lane.b32.xlu0 %v4239_v9, %s5014_s23  ;;  %724 = vrot.lane.b32.xlu1 %v4239_v9, %s4996_s26 }
  0xe1   : > { %3827 = vmatprep.subr.mxu0 %v4095_v0 }
  0xe4   : > { %735 = vrot.lane.b32.xlu0 %v4249_v12, %s5010_s22  ;;  %691 = vrot.lane.b32.xlu1 %v4239_v9, %s5016_s27  ;;  %s5052_s22 = smov 96  }
  0xe8   : > { %726 = vrot.lane.b32.xlu0 %v4249_v12, %s4996_s26  ;;  %715 = vrot.lane.b32.xlu1 %v4249_v12, %s5008_s21  ;;  %s5051_s21 = smov 112  }
  0xec   : > { %693 = vrot.lane.b32.xlu0 %v4249_v12, %s5016_s27  ;;  %704 = vrot.lane.b32.xlu1 %v4249_v12, %s5014_s23 }
  0xf0   : > { %682 = vrot.lane.b32.xlu0 %v4249_v12, %s5006_s29  ;;  %680 = vrot.lane.b32.xlu1 %v4239_v9, %s5006_s29  ;;  %s5038_s29 = smov 120  }
  0xf4   : > { %662 = vrot.lane.b32.xlu0 %v4249_v12, %s5000_s0  ;;  %660 = vrot.lane.b32.xlu1 %v4239_v9, %s5000_s0  ;;  %s4121_s0 = smov 80  }
  0xf8   : > { %673 = vrot.lane.b32.xlu0 %v4249_v12, %s4998_s30  ;;  %671 = vrot.lane.b32.xlu1 %v4239_v9, %s4998_s30 }
  0xfc   : > { %748 = vperm.xlu1 %4073, %v745_v13  }
 0x14e   : > { %v714_v17 = vpop.permute.xlu0 %713  ;;  %v734_v18 = vpop.permute.xlu1 %733 }
 0x152   : > { %v703_v21 = vpop.permute.xlu0 %702  ;;  %v725_v22 = vpop.permute.xlu1 %724 }
 0x156   : > { %v736_v25 = vpop.permute.xlu0 %735  ;;  %v692_v26 = vpop.permute.xlu1 %691 }
 0x157   : > { %v741_v27 = vsel %vm737_vm4, %v736_v25, 0.0  ;;  %v738_v28 = vsel %vm737_vm4, %v734_v18, %v736_v25  ;;  %v699_v47 = vsel %vm695_vm10, 0.0, %v692_v26 }
 0x158   : > { %v743_v29 = vmul.f32 %v4284_v23, %v741_v27  ;;  %v742_v30 = vmul.f32 %v4287_v24, %v738_v28  ;;  %v700_v53 = vmul.f32 %v4300_v37, %v699_v47 }
 0x15a   : > { %769 = vmatprep.subr.mxu1 %v743_v29  ;;  %v727_v32 = vpop.permute.xlu0 %726  ;;  %v716_v33 = vpop.permute.xlu1 %715 }
 0x15b   : > { %v718_v34 = vsel %vm717_vm7, %v714_v17, %v716_v33  ;;  %v721_v35 = vsel %vm717_vm7, %v716_v33, 0.0  ;;  %770 = vmatpush1.msra.mxu1 %v742_v30  ;;  %v729_v36 = vsel %vm728_vm8, %v725_v22, %v727_v32 }
 0x15c   : > { %3620 = vmatprep.subr.msk.mxu1 %vm728_vm8, %v727_v32  ;;  %v723_v38 = vmul.f32 %v4294_v31, %v721_v35  ;;  %v722_v39 = vmul.f32 %v4300_v37, %v718_v34 }
 0x15d   : > { %772 = vmatpush1.msra.mxu1 %v729_v36 }
 0x15e   : > { %v694_v40 = vpop.permute.xlu0 %693  ;;  %773 = vmatprep.subr.mxu1 %v723_v38  ;;  %v705_v41 = vpop.permute.xlu1 %704 }
 0x15f   : > { %v707_v42 = vsel %vm706_vm9, %v703_v21, %v705_v41  ;;  %v710_v43 = vsel %vm706_vm9, %v705_v41, 0.0  ;;  %774 = vmatpush1.msra.mxu1 %v722_v39  ;;  %v696_v46 = vsel %vm695_vm10, %v692_v26, %v694_v40 }
 0x160   : > { %v712_v44 = vmul.f32 %v4284_v23, %v710_v43  ;;  %v711_v45 = vmul.f32 %v4287_v24, %v707_v42  ;;  %v701_v51 = vmul.f32 %v4294_v31, %v696_v46 }
 0x162   : > { %v683_v48 = vpop.permute.xlu0 %682  ;;  %775 = vmatprep.subr.mxu1 %v712_v44  ;;  %v681_v49 = vpop.permute.xlu1 %680 }
 0x163   : > { %v685_v50 = vsel %vm5005_vm11, %v681_v49, %v683_v48  ;;  %776 = vmatpush1.msra.mxu1 %v711_v45  ;;  %v688_v52 = vsel %vm5005_vm11, 0.0, %v681_v49  ;;  %vm4611_vm11 = vmneg %vm2041_vm6 }
 0x164   : > { %777 = vmatprep.subr.mxu1 %v4249_v12  ;;  %v690_v56 = vmul.f32 %v4284_v23, %v685_v50  ;;  %v689_v57 = vmul.f32 %v4287_v24, %v688_v52 }
 0x165   : > { %778 = vmatpush1.msra.mxu1 %v4239_v9 }
 0x166   : > { %v663_v54 = vpop.permute.xlu0 %662  ;;  %779 = vmatprep.subr.mxu1 %v701_v51  ;;  %v661_v55 = vpop.permute.xlu1 %660 }
 0x167   : > { %780 = vmatpush1.msra.mxu1 %v700_v53  ;;  %v665_v58 = vsel %vm4991_vm12, %v661_v55, %v663_v54  ;;  %v668_v59 = vsel %vm4991_vm12, 0.0, %v661_v55  ;;  %vm2052_vm12 = vcmask 457728  }
 0x168   : > { %781 = vmatprep.subr.mxu1 %v690_v56  ;;  %v670_v1 = vmul.f32 %v4294_v31, %v665_v58  ;;  %v669_v2 = vmul.f32 %v4300_v37, %v668_v59 }
 0x169   : > { %782 = vmatpush1.msra.mxu1 %v689_v57 }
 0x16a   : > { %v674_v60 = vpop.permute.xlu0 %673  ;;  %v672_v61 = vpop.permute.xlu1 %671 }
 0x16b   : > { %v676_v63 = vsel %vm5004_vm13, %v672_v61, %v674_v60 }
 0x16c   : > { %783 = vmatprep.subr.mxu1 %v676_v63 }
 0x16d   : > { %3622 = vmatpush1.msk.msra.mxu1 %vm4322_vm14, %v672_v61 }
 0x16e   : > { %785 = vmatprep.subr.mxu1 %v670_v1 }
 0x16f   : > { %786 = vmatpush1.msra.mxu1 %v669_v2 }
 0x170   : > { %3623 = vmatmul.mubr.msk.f32.vlgmr.msra.gmra.mxu1 %vm751_vm15, %v744_v3  ;;  %3869 = vmatprep.subr.mxu1 %v4095_v0 }
 0x171   : > { %3873 = vmatprep.mubr.msk.f32.mxu1 %vm4106_vm2, %v4095_v0  ;;  %3870 = vmatpush3.msk.msra.mxu1 %vm4362_vm3, %v4105_v8 }
 0x172   : > { %3871 = vmatprep.subr.mxu1 %v4095_v0 }
 0x173   : > { %3872 = vmatpush3.msk.msra.mxu1 %vm4370_vm5, %v4105_v8 }
 0x174   : > { %3883 = vmatprep.subr.mxu1 %v4095_v0 }
 0x177   : > { %v749_v13 = vpop.permute.xlu1 %748 }
 0x230   : > { %v821_v14 = vpop.f32.mrf.mxu1 }
 0x231   : > { %v822_v16 = vadd.f32 %v821_v14, %v749_v13 }
 0x232   : > { %v823_v17 = vpop.f32.mrf.mxu1 }
 0x233   : > { %v4379_v18 = vmax.f32 %v822_v16, 0.0  ;;  %v824_v19 = vadd.f32 %v823_v17, %v749_v13 }
 0x235   : > { %v4381_v20 = vmax.f32 %v824_v19, 0.0  ;;  %846 = vrot.lane.b32.xlu0 %v4379_v18, %s4996_s26 }
 0x237   : > { %1430 = vrot.lane.b32.xlu1 %v4381_v20, %s4996_s26  ;;  %s4119_s26 = smov 9  }
 0x2a7   : > { %v4387_v21 = vpop.permute.xlu0 %846 }
 0x2a8   : > { %v849_v22 = vmax.f32 %v4379_v18, %v4387_v21 }
 0x2a9   : > { %v4391_v25 = vpop.permute.xlu1 %1430 }
 0x2aa   : > { %1139 = vrot.lane.b32.xlu1 %v849_v22, %s4987_s18  ;;  %994 = vrot.lane.b32.xlu0 %v849_v22, %s4989_s19  ;;  %v4398_v26 = vmax.f32 %v4381_v20, %v4391_v25 }
 0x2ab   : > { %3825 = vmatmul.mubr.msk.f32.vlgmr.msra.gmra.mxu0 %vm5004_vm13, %v849_v22 }
 0x2ac   : > { %3828 = vmatpush3.msk.msra.mxu0 %vm4362_vm3, %v4105_v8  ;;  %3831 = vmatprep.mubr.msk.f32.mxu0 %vm4106_vm2, %v4095_v0 }
 0x2ad   : > { %3829 = vmatprep.subr.mxu0 %v4095_v0 }
 0x2ae   : > { %3830 = vmatpush3.msk.msra.mxu0 %vm4370_vm5, %v4105_v8  ;;  %1578 = vrot.lane.b32.xlu1 %v4398_v26, %s4989_s19  ;;  %s4992_s19 = smov 48  }
 0x2af   : > { %1284 = vrot.lane.b32.xlu0 %v849_v22, %s4994_s1  ;;  %3832 = vmatmul.mubr.msk.f32.vlgmr.msra.gmra.mxu0 %vm5004_vm13, %v849_v22 }
 0x2b0   : > { %3834 = vmatprep.subr.mxu0 %v4095_v0  ;;  %3838 = vmatprep.mubr.msk.f32.mxu0 %vm4106_vm2, %v4095_v0 }
 0x2b1   : > { %3835 = vmatpush3.msk.msra.mxu0 %vm4341_vm0, %v4105_v8 }
 0x2b2   : > { %1868 = vrot.lane.b32.xlu1 %v4398_v26, %s4994_s1  ;;  %3836 = vmatprep.subr.mxu0 %v4095_v0 }
 0x2b3   : > { %1723 = vrot.lane.b32.xlu0 %v4398_v26, %s4987_s18  ;;  %3837 = vmatpush3.msk.msra.mxu0 %vm4350_vm1, %v4105_v8  ;;  %s4112_s18 = smov 40  }
 0x2b4   : > { %3841 = vmatprep.subr.mxu0 %v4095_v0 }
 0x31c   : > { %v995_v27 = vpop.permute.xlu0 %994  ;;  %v1140_v29 = vpop.permute.xlu1 %1139 }
 0x31d   : > { %3839 = vmatmul.mubr.msk.f32.vlgmr.msra.gmra.mxu0 %vm5004_vm13, %v995_v27 }
 0x31e   : > { %3842 = vmatpush3.msk.msra.mxu0 %vm4362_vm3, %v4105_v8  ;;  %3845 = vmatprep.mubr.msk.f32.mxu0 %vm4106_vm2, %v4095_v0 }
 0x31f   : > { %3843 = vmatprep.subr.mxu0 %v4095_v0 }
 0x320   : > { %3844 = vmatpush3.msk.msra.mxu0 %vm4370_vm5, %v4105_v8  ;;  %v1579_v30 = vpop.permute.xlu1 %1578 }
 0x321   : > { %v1285_v28 = vpop.permute.xlu0 %1284  ;;  %3846 = vmatmul.mubr.msk.f32.vlgmr.msra.gmra.mxu0 %vm5004_vm13, %v995_v27  ;;  %3848 = vmatprep.subr.mxu0 %v4095_v0 }
 0x322   : > { %3874 = vmatmul.mubr.msk.f32.vlgmr.msra.gmra.mxu1 %vm5004_vm13, %v1285_v28  ;;  %3849 = vmatpush3.msk.msra.mxu0 %vm4341_vm0, %v4105_v8 }
 0x323   : > { %3884 = vmatpush3.msk.msra.mxu1 %vm4362_vm3, %v4105_v8  ;;  %3850 = vmatprep.subr.mxu0 %v4095_v0 }
 0x324   : > { %3885 = vmatprep.subr.mxu1 %v4095_v0  ;;  %3887 = vmatprep.mubr.msk.f32.mxu1 %vm4106_vm2, %v4095_v0  ;;  %v1869_v33 = vpop.permute.xlu1 %1868 }
 0x325   : > { %3886 = vmatpush3.msk.msra.mxu1 %vm4370_vm5, %v4105_v8  ;;  %3851 = vmatpush3.msk.msra.mxu0 %vm4350_vm1, %v4105_v8  ;;  %v1724_v32 = vpop.permute.xlu0 %1723 }
 0x326   : > { %3852 = vmatprep.mubr.msk.f32.mxu0 %vm4106_vm2, %v4095_v0  ;;  %3855 = vmatprep.subr.mxu0 %v4095_v0 }
 0x327   : > { %3853 = vmatmul.mubr.msk.f32.vlgmr.msra.gmra.mxu0 %vm5004_vm13, %v1140_v29  ;;  %3888 = vmatmul.mubr.msk.f32.vlgmr.msra.gmra.mxu1 %vm5004_vm13, %v4398_v26 }
 0x328   : > { %3897 = vmatprep.subr.mxu1 %v4095_v0  ;;  %3856 = vmatpush3.msk.msra.mxu0 %vm4362_vm3, %v4105_v8 }
 0x329   : > { %3898 = vmatpush3.msk.msra.mxu1 %vm4362_vm3, %v4105_v8  ;;  %3857 = vmatprep.subr.mxu0 %v4095_v0 }
 0x32a   : > { %3899 = vmatprep.subr.mxu1 %v4095_v0  ;;  %3858 = vmatpush3.msk.msra.mxu0 %vm4370_vm5, %v4105_v8 }
 0x32b   : > { %3859 = vmatprep.mubr.msk.f32.mxu0 %vm4106_vm2, %v4095_v0  ;;  %3900 = vmatpush3.msk.msra.mxu1 %vm4370_vm5, %v4105_v8 }
 0x32c   : > { %3901 = vmatprep.mubr.msk.f32.mxu1 %vm4106_vm2, %v4095_v0  ;;  %3860 = vmatmul.mubr.msk.f32.vlgmr.msra.gmra.mxu0 %vm5004_vm13, %v1140_v29 }
 0x32d   : > { %3862 = vmatprep.subr.mxu0 %v4095_v0  ;;  %3902 = vmatmul.mubr.msk.f32.vlgmr.msra.gmra.mxu1 %vm5004_vm13, %v1579_v30 }
 0x32e   : > { %3911 = vmatprep.subr.mxu1 %v4095_v0  ;;  %3863 = vmatpush3.msk.msra.mxu0 %vm4341_vm0, %v4105_v8 }
 0x32f   : > { %3912 = vmatpush3.msk.msra.mxu1 %vm4362_vm3, %v4105_v8  ;;  %3864 = vmatprep.subr.mxu0 %v4095_v0 }
 0x330   : > { %3913 = vmatprep.subr.mxu1 %v4095_v0  ;;  %3865 = vmatpush3.msk.msra.mxu0 %vm4350_vm1, %v4105_v8 }
 0x331   : > { %3866 = vmatprep.mubr.msk.f32.mxu0 %vm4106_vm2, %v4095_v0  ;;  %3914 = vmatpush3.msk.msra.mxu1 %vm4370_vm5, %v4105_v8 }
 0x332   : > { %3915 = vmatprep.mubr.msk.f32.mxu1 %vm4106_vm2, %v4095_v0  ;;  %3867 = vmatmul.mubr.msk.f32.vlgmr.msra.gmra.mxu0 %vm5004_vm13, %v1285_v28 }
 0x333   : > { %3876 = vmatprep.subr.mxu0 %v4095_v0  ;;  %3916 = vmatmul.mubr.msk.f32.vlgmr.msra.gmra.mxu1 %vm5004_vm13, %v1724_v32 }
 0x334   : > { %3925 = vmatprep.subr.mxu1 %v4095_v0  ;;  %3877 = vmatpush3.msk.msra.mxu0 %vm4341_vm0, %v4105_v8 }
 0x335   : > { %3926 = vmatpush3.msk.msra.mxu1 %vm4362_vm3, %v4105_v8  ;;  %3878 = vmatprep.subr.mxu0 %v4095_v0  ;;  %vm2048_vm3 = vcmask 326656  }
 0x336   : > { %3927 = vmatprep.subr.mxu1 %v4095_v0  ;;  %3879 = vmatpush3.msk.msra.mxu0 %vm4350_vm1, %v4105_v8 }
 0x337   : > { %3880 = vmatprep.mubr.msk.f32.mxu0 %vm4106_vm2, %v4095_v0  ;;  %3928 = vmatpush3.msk.msra.mxu1 %vm4370_vm5, %v4105_v8  ;;  %vm5002_vm5 = vcmask 392192  }
 0x338   : > { %3929 = vmatprep.mubr.msk.f32.mxu1 %vm4106_vm2, %v4095_v0  ;;  %3881 = vmatmul.mubr.msk.f32.vlgmr.msra.gmra.mxu0 %vm5004_vm13, %v4398_v26 }
 0x339   : > { %3890 = vmatprep.subr.mxu0 %v4095_v0  ;;  %3930 = vmatmul.mubr.msk.f32.vlgmr.msra.gmra.mxu1 %vm5004_vm13, %v1869_v33 }
 0x33a   : > { %3891 = vmatpush3.msk.msra.mxu0 %vm4341_vm0, %v4105_v8  ;;  %3894 = vmatprep.mubr.msk.f32.mxu0 %vm4106_vm2, %v4095_v0 }
 0x33b   : > { %3892 = vmatprep.subr.mxu0 %v4095_v0 }
 0x33c   : > { %3893 = vmatpush3.msk.msra.mxu0 %vm4350_vm1, %v4105_v8 }
 0x33d   : > { %3895 = vmatmul.mubr.msk.f32.vlgmr.msra.gmra.mxu0 %vm5004_vm13, %v1579_v30  ;;  %3904 = vmatprep.subr.mxu0 %v4095_v0 }
 0x33e   : > { %3905 = vmatpush3.msk.msra.mxu0 %vm4341_vm0, %v4105_v8  ;;  %3908 = vmatprep.mubr.msk.f32.mxu0 %vm4106_vm2, %v4095_v0 }
 0x33f   : > { %3906 = vmatprep.subr.mxu0 %v4095_v0 }
 0x340   : > { %3907 = vmatpush3.msk.msra.mxu0 %vm4350_vm1, %v4105_v8 }
 0x341   : > { %3909 = vmatmul.mubr.msk.f32.vlgmr.msra.gmra.mxu0 %vm5004_vm13, %v1724_v32  ;;  %3918 = vmatprep.subr.mxu0 %v4095_v0 }
 0x342   : > { %3919 = vmatpush3.msk.msra.mxu0 %vm4341_vm0, %v4105_v8  ;;  %3922 = vmatprep.mubr.msk.f32.mxu0 %vm4106_vm2, %v4095_v0  ;;  %vm2044_vm0 = vcmask 195584  }
 0x343   : > { %3920 = vmatprep.subr.mxu0 %v4095_v0 }
 0x344   : > { %3921 = vmatpush3.msk.msra.mxu0 %vm4350_vm1, %v4105_v8  ;;  %vm5003_vm1 = vcmask 261120  }
 0x345   : > { %3923 = vmatmul.mubr.msk.f32.vlgmr.msra.gmra.mxu0 %vm5004_vm13, %v1869_v33  ;;  %3932 = vmatprep.subr.mxu0 %v4095_v0 }
 0x346   : > { %3950 = vmatprep.mubr.msk.f32.mxu0 %vm4106_vm2, %v4095_v0 }
 0x36b   : > { %v919_v34 = vpop.f32.mrf.mxu0 }
 0x36d   : > { %v3826_v35 = vpop.f32.mrf.mxu0 }
 0x36f   : > { %v989_v36 = vpop.f32.mrf.mxu0 }
 0x370   : > { %v993_v38 = vmax.f32 %v919_v34, %v989_v36 }
 0x371   : > { %v3833_v39 = vpop.f32.mrf.mxu0 }
 0x372   : > { %v2054_v39 = vand.u32 7, %v4279_v15 }
 0x3dd   : > { %v1064_v40 = vpop.f32.mrf.mxu0 }
 0x3df   : > { %v3840_v41 = vpop.f32.mrf.mxu0 }
 0x3e1   : > { %v1134_v42 = vpop.f32.mrf.mxu0 }
 0x3e2   : > { %v1138_v43 = vmax.f32 %v1064_v40, %v1134_v42  ;;  %v1424_v44 = vpop.f32.mrf.mxu1 }
 0x3e3   : > { %v3847_v45 = vpop.f32.mrf.mxu0 }
 0x3e4   : > { %v3875_v46 = vpop.f32.mrf.mxu1  ;;  %2014 = vrot.lane.b32.xlu0 %v1138_v43, %s4110_s20 }
 0x3e7   : > { %v1209_v47 = vpop.f32.mrf.mxu0  ;;  %v1573_v48 = vpop.f32.mrf.mxu1 }
 0x3e9   : > { %v3854_v49 = vpop.f32.mrf.mxu0  ;;  %v3889_v50 = vpop.f32.mrf.mxu1 }
 0x3ec   : > { %v1279_v51 = vpop.f32.mrf.mxu0 }
 0x3ed   : > { %v1283_v52 = vmax.f32 %v1209_v47, %v1279_v51  ;;  %v1718_v53 = vpop.f32.mrf.mxu1 }
 0x3ee   : > { %v3861_v54 = vpop.f32.mrf.mxu0 }
 0x3ef   : > { %v3903_v55 = vpop.f32.mrf.mxu1  ;;  %2018 = vrot.lane.b32.xlu1 %v1283_v52, %s4998_s30  ;;  %s5039_s30 = smov 111  }
 0x3f2   : > { %v1354_v56 = vpop.f32.mrf.mxu0 }
 0x3f3   : > { %v1428_v57 = vmax.f32 %v1354_v56, %v1424_v44  ;;  %v1863_v58 = vpop.f32.mrf.mxu1 }
 0x3f4   : > { %v3868_v59 = vpop.f32.mrf.mxu0 }
 0x3f5   : > { %v3917_v60 = vpop.f32.mrf.mxu1  ;;  %2022 = vrot.lane.b32.xlu0 %v1428_v57, %s4111_s28  ;;  %s4114_s28 = smov 56  }
 0x3f8   : > { %v1503_v61 = vpop.f32.mrf.mxu0 }
 0x3f9   : > { %v1577_v63 = vmax.f32 %v1503_v61, %v1573_v48  ;;  %v2008_v1 = vpop.f32.mrf.mxu1 }
 0x3fa   : > { %v3882_v2 = vpop.f32.mrf.mxu0 }
 0x3fb   : > { %v3931_v3 = vpop.f32.mrf.mxu1  ;;  %2026 = vrot.lane.b32.xlu1 %v1577_v63, %s4994_s1  ;;  %s4118_s1 = smov 7  }
 0x3fd   : > { %v1648_v5 = vpop.f32.mrf.mxu0 }
 0x3fe   : > { %v1722_v6 = vmax.f32 %v1648_v5, %v1718_v53 }
 0x3ff   : > { %v3896_v7 = vpop.f32.mrf.mxu0 }
 0x400   : > { %2030 = vrot.lane.b32.xlu0 %v1722_v6, %s4112_s18  ;;  %s4115_s18 = smov 121  }
 0x401   : > { %v1793_v9 = vpop.f32.mrf.mxu0 }
 0x402   : > { %v1867_v10 = vmax.f32 %v1793_v9, %v1863_v58  ;;  %v2225_v9 = vld [vmem:[%s4977_s9] sm:$0xff] }
 0x403   : > { %v3910_v11 = vpop.f32.mrf.mxu0  ;;  %3971 = vmatprep.mubr.msk.f32.mxu1 %vm751_vm15, %v2225_v9 }
 0x404   : > { %2034 = vrot.lane.b32.xlu1 %v1867_v10, %s4992_s19  ;;  %s5012_s19 = smov 120   ;;  %v2228_v10 = vld [vmem:[%s4978_s10 + $0x8] sm:$0xff]  ;;  %v2227_v11 = vld [vmem:[%s4978_s10] sm:$0xff] }
 0x405   : > { %v1938_v12 = vpop.f32.mrf.mxu0 }
 0x406   : > { %v2012_v13 = vmax.f32 %v1938_v12, %v2008_v1  ;;  %v2105_v1 = vld [vmem:[%s4973_s5] sm:$0xff] }
 0x407   : > { %v3924_v14 = vpop.f32.mrf.mxu0 }
 0x408   : > { %2038 = vrot.lane.b32.xlu0 %v2012_v13, %s4114_s28  ;;  %s4116_s28 = smov 119  }
 0x456   : > { %v2015_v16 = vpop.permute.xlu0 %2014 }
 0x457   : > { %v2042_v26 = vsel %vm2041_vm6, %v993_v38, %v2015_v16  ;;  %v2106_v38 = vld [vmem:[%s4974_s6] sm:$0xff] }
 0x461   : > { %v2019_v17 = vpop.permute.xlu1 %2018 }
 0x462   : > { %v2043_v27 = vsel %vm5004_vm13, %v2042_v26, %v2019_v17  ;;  %vm2086_vm13 = vcmask 515072  }
 0x467   : > { %v2023_v19 = vpop.permute.xlu0 %2022 }
 0x468   : > { %v2045_v29 = vsel %vm2044_vm0, %v2043_v27, %v2023_v19  ;;  %vm2058_vm0 = vcmp.ne.s32.totalorder %v2054_v39, 7 }
 0x469   : > { %v4587_v40 = vsel %vm2058_vm0, 1.0, %v4095_v0  ;;  %vm2075_vm0 = vcmask 56320  }
 0x46d   : > { %v2027_v22 = vpop.permute.xlu1 %2026 }
 0x46e   : > { %v2047_v32 = vsel %vm5003_vm1, %v2045_v29, %v2027_v22  ;;  %vm2092_vm1 = vcmask 465920  }
 0x472   : > { %v2031_v28 = vpop.permute.xlu0 %2030 }
 0x473   : > { %v2049_v33 = vsel %vm2048_vm3, %v2047_v32, %v2031_v28  ;;  %vm2102_vm3 = vcmask 449536  }
 0x476   : > { %v2035_v30 = vpop.permute.xlu1 %2034 }
 0x477   : > { %v2051_v34 = vsel %vm5002_vm5, %v2049_v33, %v2035_v30  ;;  %vm2055_vm5 = vcmp.ne.s32.totalorder %v2054_v39, 0 }
 0x478   : > { %v4592_v45 = vsel %vm2055_vm5, 1.0, %v4095_v0  ;;  %vm2065_vm5 = vcmask 72704  }
 0x47a   : > { %v2039_v35 = vpop.permute.xlu0 %2038 }
 0x47b   : > { %v2053_v36 = vsel %vm2052_vm12, %v2051_v34, %v2039_v35 }
 0x47c   : > { %2089 = vrot.lane.b32.xlu0 %v2053_v36, %s4115_s18  ;;  %2099 = vrot.lane.b32.xlu1 %v2053_v36, %s4116_s28 }
 0x480   : > { %2083 = vrot.lane.b32.xlu0 %v2053_v36, %s5014_s23  ;;  %2095 = vrot.lane.b32.xlu1 %v2053_v36, %s5012_s19 }
 0x484   : > { %2072 = vrot.lane.b32.xlu0 %v2053_v36, %s4118_s1  ;;  %2078 = vrot.lane.b32.xlu1 %v2053_v36, %s5016_s27 }
 0x488   : > { %2068 = vrot.lane.b32.xlu0 %v2053_v36, %s4110_s20  ;;  %2062 = vrot.lane.b32.xlu1 %v2053_v36, %s4119_s26 }
 0x48c   : > { %2109 = vperm.xlu1 %4073, %v2106_v38  }
 0x4ee   : > { %v2090_v41 = vpop.permute.xlu0 %2089  ;;  %v2100_v42 = vpop.permute.xlu1 %2099 }
 0x4ef   : > { %v2103_v43 = vsel %vm2102_vm3, %v2100_v42, 0.0  ;;  %v2093_v46 = vsel %vm2092_vm1, %v2090_v41, 0.0  ;;  %v2226_v42 = vld [vmem:[%s4977_s9 + $0x8] sm:$0xff] }
 0x4f0   : > { %v2104_v44 = vmul.f32 %v4587_v40, %v2103_v43  ;;  %v2094_v50 = vmul.f32 %v4592_v45, %v2093_v46 }
 0x4f2   : > { %v2084_v47 = vpop.permute.xlu0 %2083  ;;  %3933 = vmatpush3.msra.mxu0 %v2104_v44  ;;  %v2096_v48 = vpop.permute.xlu1 %2095 }
 0x4f3   : > { %v2087_v49 = vsel %vm2086_vm13, %v2084_v47, 0.0  ;;  %3934 = vmatprep.subr.mxu0 %v4095_v0 }
 0x4f4   : > { %3935 = vmatpush3.msk.msra.mxu0 %vm2052_vm12, %v2096_v48  ;;  %v2088_v51 = vmul.f32 %v4587_v40, %v2087_v49 }
 0x4f5   : > { %3936 = vmatprep.subr.mxu0 %v4095_v0 }
 0x4f6   : > { %v2073_v52 = vpop.permute.xlu0 %2072  ;;  %3937 = vmatpush3.msra.mxu0 %v2094_v50  ;;  %v2079_v53 = vpop.permute.xlu1 %2078 }
 0x4f7   : > { %v2081_v54 = vsel %vm695_vm10, 0.0, %v2079_v53  ;;  %3938 = vmatprep.subr.mxu0 %v4095_v0  ;;  %v2076_v55 = vsel %vm2075_vm0, 0.0, %v2073_v52 }
 0x4f8   : > { %3939 = vmatpush3.msra.mxu0 %v2088_v51  ;;  %v2082_v56 = vmul.f32 %v4592_v45, %v2081_v54  ;;  %v2077_v58 = vmul.f32 %v4587_v40, %v2076_v55 }
 0x4f9   : > { %3940 = vmatprep.subr.mxu0 %v4095_v0 }
 0x4fa   : > { %3941 = vmatpush3.msra.mxu0 %v2053_v36  ;;  %v2063_v57 = vpop.permute.xlu1 %2062  ;;  %v2069_v61 = vpop.permute.xlu0 %2068 }
 0x4fb   : > { %3942 = vmatprep.subr.mxu0 %v4095_v0  ;;  %v2066_v59 = vsel %vm2065_vm5, 0.0, %v2063_v57  ;;  %v2369_v57 = vld [vmem:[%s4982_s14] sm:$0xff] }
 0x4fc   : > { %3943 = vmatpush3.msra.mxu0 %v2082_v56  ;;  %v2067_v63 = vmul.f32 %v4592_v45, %v2066_v59 }
 0x4fd   : > { %3944 = vmatprep.subr.mxu0 %v4095_v0 }
 0x4fe   : > { %3945 = vmatpush3.msra.mxu0 %v2077_v58 }
 0x4ff   : > { %3946 = vmatprep.subr.mxu0 %v4095_v0 }
 0x500   : > { %3947 = vmatpush3.msk.msra.mxu0 %vm4611_vm11, %v2069_v61 }
 0x501   : > { %3948 = vmatprep.subr.mxu0 %v4095_v0 }
 0x502   : > { %3949 = vmatpush3.msra.mxu0 %v2067_v63 }
 0x503   : > { %3951 = vmatmul.mubr.msk.f32.vlgmr.msra.gmra.mxu0 %vm751_vm15, %v2105_v1  ;;  %3974 = vmatprep.subr.mxu0 %v4095_v0 }
 0x504   : > { %3992 = vmatprep.mubr.msk.f32.mxu0 %vm4106_vm2, %v4095_v0 }
 0x507   : > { %v2110_v2 = vpop.permute.xlu1 %2109 }
 0x5c3   : > { %v2181_v3 = vpop.f32.mrf.mxu0 }
 0x5c4   : > { %v2182_v5 = vadd.f32 %v2181_v3, %v2110_v2 }
 0x5c5   : > { %v3952_v6 = vpop.f32.mrf.mxu0 }
 0x5c6   : > { %v2185_v7 = vmax.f32 %v2182_v5, 0.0 }
 0x5c8   : > { %2211 = vrot.lane.b32.xlu1 %v2185_v7, %s4115_s18  ;;  %2220 = vrot.lane.b32.xlu0 %v2185_v7, %s4116_s28 }
 0x5cc   : > { %2206 = vrot.lane.b32.xlu1 %v2185_v7, %s5014_s23  ;;  %2216 = vrot.lane.b32.xlu0 %v2185_v7, %s5012_s19  ;;  %s4120_s19 = smov 104  }
 0x5d0   : > { %2196 = vrot.lane.b32.xlu1 %v2185_v7, %s4118_s1  ;;  %2201 = vrot.lane.b32.xlu0 %v2185_v7, %s5016_s27 }
 0x5d4   : > { %2192 = vrot.lane.b32.xlu1 %v2185_v7, %s4110_s20  ;;  %2187 = vrot.lane.b32.xlu0 %v2185_v7, %s4119_s26 }
 0x5d8   : > { %2236 = vperm.xlu1 %4073, %v2228_v10   ;;  %2231 = vperm.xlu0 %4072, %v2227_v11  }
 0x63a   : > { %v2212_v12 = vpop.permute.xlu1 %2211  ;;  %v2221_v13 = vpop.permute.xlu0 %2220 }
 0x63b   : > { %v2223_v14 = vsel %vm2102_vm3, %v2221_v13, 0.0  ;;  %v2214_v17 = vsel %vm2092_vm1, %v2212_v12, 0.0 }
 0x63c   : > { %v2224_v16 = vmul.f32 %v4587_v40, %v2223_v14  ;;  %v2215_v27 = vmul.f32 %v4592_v45, %v2214_v17 }
 0x63e   : > { %v2207_v19 = vpop.permute.xlu1 %2206  ;;  %3953 = vmatprep.subr.mxu1 %v2224_v16  ;;  %v2217_v22 = vpop.permute.xlu0 %2216 }
 0x63f   : > { %v2209_v26 = vsel %vm2086_vm13, %v2207_v19, 0.0  ;;  %3954 = vmatpush3.msra.mxu1 %v2224_v16 }
 0x640   : > { %3955 = vmatprep.subr.msk.mxu1 %vm2052_vm12, %v2217_v22  ;;  %v2210_v28 = vmul.f32 %v4587_v40, %v2209_v26 }
 0x641   : > { %3956 = vmatpush3.msk.msra.mxu1 %vm2052_vm12, %v2217_v22 }
 0x642   : > { %v2197_v29 = vpop.permute.xlu1 %2196  ;;  %3957 = vmatprep.subr.mxu1 %v2215_v27  ;;  %v2202_v30 = vpop.permute.xlu0 %2201 }
 0x643   : > { %v2204_v32 = vsel %vm695_vm10, 0.0, %v2202_v30  ;;  %3958 = vmatpush3.msra.mxu1 %v2215_v27  ;;  %v2199_v33 = vsel %vm2075_vm0, 0.0, %v2197_v29 }
 0x644   : > { %3959 = vmatprep.subr.mxu1 %v2210_v28  ;;  %v2205_v34 = vmul.f32 %v4592_v45, %v2204_v32  ;;  %v2200_v36 = vmul.f32 %v4587_v40, %v2199_v33 }
 0x645   : > { %3960 = vmatpush3.msra.mxu1 %v2210_v28 }
 0x646   : > { %3961 = vmatprep.subr.mxu1 %v2185_v7  ;;  %v2188_v35 = vpop.permute.xlu0 %2187  ;;  %v2193_v39 = vpop.permute.xlu1 %2192 }
 0x647   : > { %3962 = vmatpush3.msra.mxu1 %v2185_v7  ;;  %v2190_v38 = vsel %vm2065_vm5, 0.0, %v2188_v35 }
 0x648   : > { %3963 = vmatprep.subr.mxu1 %v2205_v34  ;;  %v2191_v41 = vmul.f32 %v4592_v45, %v2190_v38 }
 0x649   : > { %3964 = vmatpush3.msra.mxu1 %v2205_v34 }
 0x64a   : > { %3965 = vmatprep.subr.mxu1 %v2200_v36 }
 0x64b   : > { %3966 = vmatpush3.msra.mxu1 %v2200_v36 }
 0x64c   : > { %3967 = vmatprep.subr.msk.mxu1 %vm4611_vm11, %v2193_v39 }
 0x64d   : > { %3968 = vmatpush3.msk.msra.mxu1 %vm4611_vm11, %v2193_v39 }
 0x64e   : > { %3969 = vmatprep.subr.mxu1 %v2191_v41 }
 0x64f   : > { %3970 = vmatpush3.msra.mxu1 %v2191_v41  ;;  %v2507_v41 = vsel %vm728_vm8, %v4387_v21, %v4391_v25 }
 0x650   : > { %3972 = vmatmul.mubr.msk.f32.vlgmr.msra.gmra.mxu1 %vm751_vm15, %v2226_v42 }
 0x651   : > { %2604 = vmatprep.mubr.f32.mxu1 %v4095_v0 }
 0x653   : > { %v2232_v44 = vpop.permute.xlu0 %2231  ;;  %v2237_v51 = vpop.permute.xlu1 %2236 }
 0x710   : > { %v3973_v43 = vpop.f32.mrf.mxu1 }
 0x711   : > { %v2317_v52 = vadd.f32 %v3973_v43, %v2237_v51 }
 0x712   : > { %v2311_v46 = vpop.f32.mrf.mxu1 }
 0x713   : > { %v2312_v47 = vadd.f32 %v2311_v46, %v2232_v44  ;;  %v2320_v54 = vmax.f32 %v2317_v52, 0.0 }
 0x715   : > { %v3687_v48 = vmul.f32 -1.442695, %v2312_v47 }
 0x717   : > { %4075 = vpow2.f32 %v3687_v48 }
 0x724   : > { %v4076_v49 = vpop.eup %4075 }
 0x725   : > { %v2324_v50 = vadd.f32 1.0, %v4076_v49 }
 0x727   : > { %4077 = vrcp.f32 %v2324_v50 }
 0x734   : > { %v4078_v53 = vpop.eup %4077 }
 0x735   : > { %v2327_v55 = vsub.f32 1.0, %v4078_v53 }
 0x737   : > { %v2328_v56 = vmul.f32 %v2327_v55, %v2320_v54 }
 0x739   : > { %2354 = vrot.lane.b32.xlu1 %v2328_v56, %s4115_s18  ;;  %2363 = vrot.lane.b32.xlu0 %v2328_v56, %s4116_s28  ;;  %s5040_s18 = smov 113   ;;  %s4122_s28 = smov 88  }
 0x73d   : > { %2349 = vrot.lane.b32.xlu1 %v2328_v56, %s5014_s23  ;;  %2359 = vrot.lane.b32.xlu0 %v2328_v56, %s5038_s29 }
 0x741   : > { %2339 = vrot.lane.b32.xlu1 %v2328_v56, %s4118_s1  ;;  %2344 = vrot.lane.b32.xlu0 %v2328_v56, %s5016_s27  ;;  %s5042_s1 = smov 17  }
 0x745   : > { %2335 = vrot.lane.b32.xlu1 %v2328_v56, %s4110_s20  ;;  %2330 = vrot.lane.b32.xlu0 %v2328_v56, %s4119_s26  ;;  %s5041_s26 = smov 15   ;;  %s5043_s20 = smov 16  }
 0x749   : > { %2512 = vrot.lane.b32.xlu1 %v4381_v20, %s5039_s30  ;;  %2372 = vperm.xlu0 %4072, %v2369_v57  }
 0x74d   : > { %2499 = vrot.lane.b32.xlu1 %v4381_v20, %s5040_s18  ;;  %2510 = vrot.lane.b32.xlu0 %v4379_v18, %s5039_s30 }
 0x751   : > { %2489 = vrot.lane.b32.xlu1 %v4381_v20, %s5014_s23  ;;  %2497 = vrot.lane.b32.xlu0 %v4379_v18, %s5040_s18 }
 0x755   : > { %2477 = vrot.lane.b32.xlu1 %v4379_v18, %s5016_s27  ;;  %2487 = vrot.lane.b32.xlu0 %v4379_v18, %s5014_s23  ;;  %s5055_s23 = smov 64  }
 0x759   : > { %2467 = vrot.lane.b32.xlu1 %v4379_v18, %s5041_s26  ;;  %2479 = vrot.lane.b32.xlu0 %v4381_v20, %s5016_s27  ;;  %s4123_s27 = smov 72  }
 0x75d   : > { %2449 = vrot.lane.b32.xlu1 %v4379_v18, %s5042_s1  ;;  %2469 = vrot.lane.b32.xlu0 %v4381_v20, %s5041_s26 }
 0x761   : > { %2459 = vrot.lane.b32.xlu1 %v4379_v18, %s5043_s20  ;;  %2451 = vrot.lane.b32.xlu0 %v4381_v20, %s5042_s1 }
 0x765   : > { %2461 = vrot.lane.b32.xlu0 %v4381_v20, %s5043_s20 }
 0x7ab   : > { %v2355_v58 = vpop.permute.xlu1 %2354  ;;  %v2364_v59 = vpop.permute.xlu0 %2363 }
 0x7ac   : > { %v2366_v61 = vsel %vm2102_vm3, %v2364_v59, 0.0  ;;  %v2357_v1 = vsel %vm2092_vm1, %v2355_v58, 0.0  ;;  %vm5048_vm3 = vcmask 130048  }
 0x7ad   : > { %v2367_v63 = vmul.f32 %v4587_v40, %v2366_v61  ;;  %v2358_v6 = vmul.f32 %v4592_v45, %v2357_v1 }
 0x7af   : > { %v2350_v2 = vpop.permute.xlu1 %2349  ;;  %3975 = vmatpush3.msra.mxu0 %v2367_v63  ;;  %v2360_v3 = vpop.permute.xlu0 %2359 }
 0x7b0   : > { %v2352_v5 = vsel %vm2086_vm13, %v2350_v2, 0.0  ;;  %3976 = vmatprep.subr.mxu0 %v4095_v0  ;;  %vm5046_vm13 = vcmask 138240  }
 0x7b1   : > { %3977 = vmatpush3.msk.msra.mxu0 %vm2052_vm12, %v2360_v3  ;;  %v2353_v7 = vmul.f32 %v4587_v40, %v2352_v5  ;;  %vm5047_vm1 = vmmov %vm5046_vm13  ;;  %v2520_v5 = vld [vmem:[%s4975_s7] sm:$0xff] }
 0x7b2   : > { %3978 = vmatprep.subr.mxu0 %v4095_v0 }
 0x7b3   : > { %v2340_v9 = vpop.permute.xlu1 %2339  ;;  %3979 = vmatpush3.msra.mxu0 %v2358_v6  ;;  %v2345_v10 = vpop.permute.xlu0 %2344  ;;  %v2521_v6 = vld [vmem:[%s4975_s7 + $0x8] sm:$0xff] }
 0x7b4   : > { %v2347_v11 = vsel %vm695_vm10, 0.0, %v2345_v10  ;;  %3980 = vmatprep.subr.mxu0 %v4095_v0  ;;  %v2342_v12 = vsel %vm2075_vm0, 0.0, %v2340_v9 }
 0x7b5   : > { %3981 = vmatpush3.msra.mxu0 %v2353_v7  ;;  %v2348_v13 = vmul.f32 %v4592_v45, %v2347_v11  ;;  %v2343_v17 = vmul.f32 %v4587_v40, %v2342_v12  ;;  %v2368_v40 = vld [vmem:[%s4981_s13] sm:$0xff]  ;;  %v2635_v7 = vmul.u32 2, %v4337_v4 }
 0x7b6   : > { %3982 = vmatprep.subr.mxu0 %v4095_v0 }
 0x7b7   : > { %v2336_v14 = vpop.permute.xlu1 %2335  ;;  %3983 = vmatpush3.msra.mxu0 %v2328_v56  ;;  %v2331_v16 = vpop.permute.xlu0 %2330  ;;  %v2637_v9 = vadd.s32 1, %v2635_v7  ;;  %vm2636_vm0 = vcmp.eq.s32.totalorder %v4279_v15, %v2635_v7 }
 0x7b8   : > { %3984 = vmatprep.subr.mxu0 %v4095_v0  ;;  %v2333_v19 = vsel %vm2065_vm5, 0.0, %v2331_v16 }
 0x7b9   : > { %3985 = vmatpush3.msra.mxu0 %v2348_v13  ;;  %v2334_v27 = vmul.f32 %v4592_v45, %v2333_v19  ;;  %vm2638_vm5 = vcmp.eq.s32.totalorder %v4279_v15, %v2637_v9  ;;  %v2522_v13 = vld [vmem:[%s4976_s8] sm:$0xff] }
 0x7ba   : > { %3986 = vmatprep.subr.mxu0 %v4095_v0 }
 0x7bb   : > { %v2513_v22 = vpop.permute.xlu1 %2512  ;;  %3987 = vmatpush3.msra.mxu0 %v2343_v17 }
 0x7bc   : > { %v2517_v26 = vsel %vm737_vm4, %v2513_v22, 0.0  ;;  %3988 = vmatprep.subr.mxu0 %v4095_v0 }
 0x7bd   : > { %v2519_v28 = vmul.f32 %v4284_v23, %v2517_v26  ;;  %3989 = vmatpush3.msk.msra.mxu0 %vm4611_vm11, %v2336_v14  ;;  %vm5044_vm11 = vcmask 121856   ;;  %v2523_v14 = vld [vmem:[%s4976_s8 + $0x8] sm:$0xff] }
 0x7be   : > { %3990 = vmatprep.subr.mxu0 %v4095_v0  ;;  %vm5045_vm12 = vmmov %vm5044_vm11 }
 0x7bf   : > { %2554 = vmatprep.subr.mxu1 %v2519_v28  ;;  %3991 = vmatpush3.msra.mxu0 %v2334_v27  ;;  %v2500_v45 = vpop.permute.xlu1 %2499 }
 0x7c0   : > { %3993 = vmatmul.mubr.msk.f32.vlgmr.msra.gmra.mxu0 %vm751_vm15, %v2368_v40  ;;  %3995 = vmatprep.subr.mxu0 %v4095_v0  ;;  %v2504_v33 = vsel %vm717_vm7, %v2500_v45, 0.0 }
 0x7c1   : > { %3997 = vmatprep.mubr.msk.f32.mxu0 %vm4106_vm2, %v4095_v0  ;;  %v2506_v38 = vmul.f32 %v4294_v31, %v2504_v33 }
 0x7c3   : > { %v2490_v60 = vpop.permute.xlu1 %2489 }
 0x7c4   : > { %v4739_v29 = vpop.permute.xlu0 %2372  ;;  %v2494_v35 = vsel %vm706_vm9, %v2490_v60, 0.0 }
 0x7c5   : > { %v2496_v44 = vmul.f32 %v4284_v23, %v2494_v35 }
 0x7c7   : > { %v2478_v42 = vpop.permute.xlu1 %2477 }
 0x7c8   : > { %v2511_v30 = vpop.permute.xlu0 %2510  ;;  %v2484_v49 = vsel %vm695_vm10, 0.0, %v2478_v42 }
 0x7c9   : > { %v2514_v32 = vsel %vm737_vm4, %v2511_v30, %v2513_v22  ;;  %v2485_v52 = vmul.f32 %v4300_v37, %v2484_v49 }
 0x7ca   : > { %v2518_v34 = vmul.f32 %v4287_v24, %v2514_v32 }
 0x7cb   : > { %v2468_v50 = vpop.permute.xlu1 %2467 }
 0x7cc   : > { %2555 = vmatpush1.msra.mxu1 %v2518_v34  ;;  %v2498_v36 = vpop.permute.xlu0 %2497  ;;  %v2474_v53 = vsel %vm5044_vm11, 0.0, %v2468_v50  ;;  %vm4788_vm11 = vmor %vm2636_vm0, %vm2638_vm5  ;;  %vm3290_vm0 = vcmask 785408  }
 0x7cd   : > { %v2501_v39 = vsel %vm717_vm7, %v2498_v36, %v2500_v45  ;;  %3692 = vmatprep.subr.msk.mxu1 %vm728_vm8, %v4391_v25  ;;  %v2475_v58 = vmul.f32 %v4287_v24, %v2474_v53  ;;  %3996 = vmatpush3.msk.msra.mxu0 %vm4788_vm11, %v4105_v8 }
 0x7ce   : > { %v2505_v43 = vmul.f32 %v4300_v37, %v2501_v39  ;;  %2557 = vmatpush1.msra.mxu1 %v2507_v41  ;;  %4000 = vmatprep.subr.mxu0 %v4095_v0 }
 0x7cf   : > { %2558 = vmatprep.subr.mxu1 %v2506_v38  ;;  %v2450_v56 = vpop.permute.xlu1 %2449 }
 0x7d0   : > { %v2488_v46 = vpop.permute.xlu0 %2487  ;;  %2559 = vmatpush1.msra.mxu1 %v2505_v43 }
 0x7d1   : > { %v2491_v47 = vsel %vm706_vm9, %v2488_v46, %v2490_v60  ;;  %2560 = vmatprep.subr.mxu1 %v2496_v44 }
 0x7d2   : > { %v2495_v48 = vmul.f32 %v4287_v24, %v2491_v47 }
 0x7d3   : > { %v2460_v61 = vpop.permute.xlu1 %2459 }
 0x7d4   : > { %v2480_v51 = vpop.permute.xlu0 %2479  ;;  %2561 = vmatpush1.msra.mxu1 %v2495_v48 }
 0x7d5   : > { %v2481_v21 = vsel %vm695_vm10, %v2478_v42, %v2480_v51  ;;  %2562 = vmatprep.subr.mxu1 %v4381_v20 }
 0x7d6   : > { %v2486_v25 = vmul.f32 %v4294_v31, %v2481_v21  ;;  %2563 = vmatpush1.msra.mxu1 %v4379_v18  ;;  %v2456_v18 = vsel %vm5047_vm1, 0.0, %v2450_v56  ;;  %vm3288_vm1 = vcmask 654336  }
 0x7d7   : > { %v2457_v3 = vmul.f32 %v4300_v37, %v2456_v18 }
 0x7d8   : > { %v2470_v54 = vpop.permute.xlu0 %2469  ;;  %2564 = vmatprep.subr.mxu1 %v2486_v25 }
 0x7d9   : > { %v2471_v55 = vsel %vm5045_vm12, %v2468_v50, %v2470_v54  ;;  %2565 = vmatpush1.msra.mxu1 %v2485_v52  ;;  %vm3286_vm12 = vcmask 523264  }
 0x7da   : > { %v2476_v57 = vmul.f32 %v4284_v23, %v2471_v55 }
 0x7dc   : > { %v2452_v59 = vpop.permute.xlu0 %2451  ;;  %2566 = vmatprep.subr.mxu1 %v2476_v57 }
 0x7dd   : > { %2567 = vmatpush1.msra.mxu1 %v2475_v58  ;;  %v2453_v20 = vsel %vm5046_vm13, %v2450_v56, %v2452_v59  ;;  %vm5057_vm13 = vcmask 261120  }
 0x7de   : > { %v2458_v2 = vmul.f32 %v4294_v31, %v2453_v20 }
 0x7e0   : > { %v2462_v63 = vpop.permute.xlu0 %2461 }
 0x7e1   : > { %v2463_v1 = vsel %vm5048_vm3, %v2460_v61, %v2462_v63 }
 0x7e2   : > { %2568 = vmatprep.subr.mxu1 %v2463_v1 }
 0x7e3   : > { %3694 = vmatpush1.msk.msra.mxu1 %vm4322_vm14, %v2460_v61 }
 0x7e4   : > { %2570 = vmatprep.subr.mxu1 %v2458_v2 }
 0x7e5   : > { %2571 = vmatpush1.msra.mxu1 %v2457_v3 }
 0x7e6   : > { %3695 = vmatmul.mubr.msk.f32.vlgmr.msra.gmra.mxu1 %vm751_vm15, %v2520_v5  ;;  %4005 = vmatprep.subr.mxu1 %v4095_v0 }
 0x7e7   : > { %2610 = vmatprep.mubr.f32.mxu1 %v4095_v0  ;;  %4006 = vmatpush3.msk.msra.mxu1 %vm4788_vm11, %v4105_v8 }
 0x7e8   : > { %4015 = vmatprep.subr.mxu1 %v4095_v0 }
 0x7ea   : > { %3696 = vmatmul.mubr.msk.f32.gmra.mxu1 %vm751_vm15, %v2521_v6 }
 0x7eb   : > { %4007 = vmatprep.mubr.msk.f32.mxu1 %vm4106_vm2, %v4095_v0 }
 0x880   : > { %v2444_v4 = vpop.f32.mrf.mxu0 }
 0x881   : > { %v2445_v11 = vadd.f32 %v2444_v4, %v4739_v29 }
 0x882   : > { %v3994_v15 = vpop.f32.mrf.mxu0 }
 0x883   : > { %v2448_v12 = vmax.f32 %v2445_v11, 0.0 }
 0x885   : > { %2789 = vrot.lane.b32.xlu0 %v2448_v12, %s5051_s21  ;;  %2715 = vrot.lane.b32.xlu1 %v2448_v12, %s5038_s29 }
 0x886   : > { %3998 = vmatmul.mubr.msk.f32.vlgmr.msra.gmra.mxu0 %vm2041_vm6, %v2448_v12 }
 0x887   : > { %4001 = vmatpush3.msk.msra.mxu0 %vm4788_vm11, %v4105_v8  ;;  %4002 = vmatprep.mubr.msk.f32.mxu0 %vm4106_vm2, %v4095_v0 }
 0x888   : > { %4010 = vmatprep.subr.mxu0 %v4095_v0 }
 0x889   : > { %2937 = vrot.lane.b32.xlu0 %v2448_v12, %s5052_s22  ;;  %2863 = vrot.lane.b32.xlu1 %v2448_v12, %s4120_s19 }
 0x88d   : > { %3085 = vrot.lane.b32.xlu0 %v2448_v12, %s4121_s0  ;;  %3011 = vrot.lane.b32.xlu1 %v2448_v12, %s4122_s28  ;;  %s5069_s28 = sshll.u32 %s5071_s25, 3 }
 0x891   : > { %2526 = vperm.xlu0 %4072, %v2522_v13   ;;  %3159 = vrot.lane.b32.xlu1 %v2448_v12, %s4123_s27  ;;  %s5062_s27 = smov 1  }
 0x895   : > { %2531 = vperm.xlu1 %4073, %v2523_v14  }
 0x8a6   : > { %v2606_v29 = vpop.f32.mrf.mxu1 }
 0x8a8   : > { %v2608_v60 = vpop.f32.mrf.mxu1 }
 0x8aa   : > { %v2612_v30 = vpop.f32.mrf.mxu1 }
 0x8ac   : > { %v4856_v32 = vpop.f32.mrf.mxu1 }
 0x8f7   : > { %v2790_v16 = vpop.permute.xlu0 %2789  ;;  %v2716_v17 = vpop.permute.xlu1 %2715 }
 0x8f8   : > { %4003 = vmatmul.mubr.msk.f32.vlgmr.msra.gmra.mxu0 %vm2041_vm6, %v2716_v17  ;;  %4008 = vmatmul.mubr.msk.f32.vlgmr.msra.gmra.mxu1 %vm2041_vm6, %v2790_v16 }
 0x8f9   : > { %4011 = vmatpush3.msk.msra.mxu0 %vm4788_vm11, %v4105_v8  ;;  %4012 = vmatprep.mubr.msk.f32.mxu0 %vm4106_vm2, %v4095_v0 }
 0x8fa   : > { %4016 = vmatpush3.msk.msra.mxu1 %vm4788_vm11, %v4105_v8  ;;  %4017 = vmatprep.mubr.msk.f32.mxu1 %vm4106_vm2, %v4095_v0 }
 0x8fb   : > { %v2938_v19 = vpop.permute.xlu0 %2937  ;;  %v2864_v22 = vpop.permute.xlu1 %2863  ;;  %4020 = vmatprep.subr.mxu0 %v4095_v0  ;;  %4025 = vmatprep.subr.mxu1 %v4095_v0 }
 0x8fc   : > { %4013 = vmatmul.mubr.msk.f32.vlgmr.msra.gmra.mxu0 %vm2041_vm6, %v2864_v22  ;;  %4018 = vmatmul.mubr.msk.f32.vlgmr.msra.gmra.mxu1 %vm2041_vm6, %v2938_v19 }
 0x8fd   : > { %4021 = vmatpush3.msk.msra.mxu0 %vm4788_vm11, %v4105_v8  ;;  %4022 = vmatprep.mubr.msk.f32.mxu0 %vm4106_vm2, %v4095_v0 }
 0x8fe   : > { %4026 = vmatpush3.msk.msra.mxu1 %vm4788_vm11, %v4105_v8  ;;  %4027 = vmatprep.mubr.msk.f32.mxu1 %vm4106_vm2, %v4095_v0 }
 0x8ff   : > { %v3086_v26 = vpop.permute.xlu0 %3085  ;;  %v3012_v27 = vpop.permute.xlu1 %3011  ;;  %4030 = vmatprep.subr.mxu0 %v4095_v0 }
 0x900   : > { %4023 = vmatmul.mubr.msk.f32.vlgmr.msra.gmra.mxu0 %vm2041_vm6, %v3012_v27  ;;  %4028 = vmatmul.mubr.msk.f32.vlgmr.msra.gmra.mxu1 %vm2041_vm6, %v3086_v26 }
 0x901   : > { %4031 = vmatpush3.msk.msra.mxu0 %vm4788_vm11, %v4105_v8  ;;  %4032 = vmatprep.mubr.msk.f32.mxu0 %vm4106_vm2, %v4095_v0  ;;  %vm5056_vm2 = vmmov %vm5048_vm3  ;;  %vm5058_vm3 = vcmask 392192  }
 0x902   : > { %3454 = vmatprep.mubr.f32.mxu1 %v4095_v0  ;;  %vm5059_vm5 = vmmov %vm5056_vm2 }
 0x903   : > { %v3160_v28 = vpop.permute.xlu1 %3159  ;;  %vm5060_vm11 = vmmov %vm5057_vm13 }
 0x904   : > { %4033 = vmatmul.mubr.msk.f32.vlgmr.msra.gmra.mxu0 %vm2041_vm6, %v3160_v28 }
 0x905   : > { %3537 = vmatprep.mubr.f32.mxu0 %v4095_v0 }
 0x90c   : > { %v2527_v48 = vpop.permute.xlu0 %2526 }
 0x90d   : > { %v2607_v49 = vadd.f32 %v2606_v29, %v2527_v48  ;;  %v2609_v51 = vadd.f32 %v2608_v60, %v2527_v48 }
 0x90f   : > { %v3697_v50 = vmul.f32 -1.442695, %v2607_v49  ;;  %v3698_v21 = vmul.f32 -1.442695, %v2609_v51 }
 0x910   : > { %v2532_v25 = vpop.permute.xlu1 %2531 }
 0x911   : > { %4079 = vpow2.f32 %v3697_v50  ;;  %v2613_v2 = vadd.f32 %v2612_v30, %v2532_v25  ;;  %v2615_v22 = vadd.f32 %v4856_v32, %v2532_v25 }
 0x912   : > { %4081 = vpow2.f32 %v3698_v21 }
 0x913   : > { %v2617_v4 = vmax.f32 %v2613_v2, 0.0  ;;  %v2618_v60 = vmax.f32 %v2615_v22, 0.0 }
 0x91e   : > { %v4080_v52 = vpop.eup %4079 }
 0x91f   : > { %v2625_v53 = vadd.f32 1.0, %v4080_v52  ;;  %v4082_v56 = vpop.eup %4081 }
 0x920   : > { %v2626_v57 = vadd.f32 1.0, %v4082_v56 }
 0x921   : > { %4083 = vrcp.f32 %v2625_v53 }
 0x922   : > { %4085 = vrcp.f32 %v2626_v57 }
 0x92e   : > { %v4084_v1 = vpop.eup %4083 }
 0x92f   : > { %v2631_v5 = vsub.f32 1.0, %v4084_v1  ;;  %v4086_v17 = vpop.eup %4085 }
 0x930   : > { %v2632_v28 = vsub.f32 1.0, %v4086_v17 }
 0x931   : > { %v2633_v12 = vmul.f32 %v2631_v5, %v2617_v4 }
 0x946   : > { %v2711_v40 = vpop.f32.mrf.mxu0 }
 0x947   : > { %3234 = vrot.lane.b32.xlu1 %v2711_v40, %s5043_s20 }
 0x948   : > { %v3999_v45 = vpop.f32.mrf.mxu0 }
 0x9b8   : > { %v2785_v8 = vpop.f32.mrf.mxu0  ;;  %v2859_v33 = vpop.f32.mrf.mxu1 }
 0x9b9   : > { %3238 = vrot.lane.b32.xlu1 %v2785_v8, %s5053_s2  ;;  %v3235_v54 = vpop.permute.xlu1 %3234 }
 0x9ba   : > { %v4004_v34 = vpop.f32.mrf.mxu0  ;;  %v4009_v35 = vpop.f32.mrf.mxu1  ;;  %v3283_v3 = vsel %vm5056_vm2, %v2711_v40, %v3235_v54  ;;  %vm5061_vm2 = vmmov %vm5058_vm3 }
 0x9bc   : > { %v2933_v36 = vpop.f32.mrf.mxu0  ;;  %v4859_v38 = vpop.f32.mrf.mxu1 }
 0x9bd   : > { %3241 = vrot.lane.b32.xlu1 %v2785_v8, %s5054_s3  ;;  %3259 = vrot.lane.b32.xlu0 %v4859_v38, %s5043_s20  ;;  %v2634_v8 = vmul.f32 %v2632_v28, %v2618_v60 }
 0x9be   : > { %v4014_v0 = vpop.f32.mrf.mxu0  ;;  %v4019_v39 = vpop.f32.mrf.mxu1 }
 0x9bf   : > { %v3464_v0 = vld [vmem:[%s4984_s16] sm:$0x7] }
 0x9c0   : > { %v3081_v41 = vpop.f32.mrf.mxu0  ;;  %v3155_v42 = vpop.f32.mrf.mxu1 }
 0x9c1   : > { %3245 = vrot.lane.b32.xlu1 %v2859_v33, %s5055_s23  ;;  %3263 = vrot.lane.b32.xlu0 %v3081_v41, %s5053_s2 }
 0x9c2   : > { %v4024_v43 = vpop.f32.mrf.mxu0  ;;  %v4029_v44 = vpop.f32.mrf.mxu1 }
 0x9c4   : > { %v3229_v46 = vpop.f32.mrf.mxu0 }
 0x9c5   : > { %3248 = vrot.lane.b32.xlu1 %v2859_v33, %s4121_s0  ;;  %3266 = vrot.lane.b32.xlu0 %v3081_v41, %s5054_s3  ;;  %s548_s3 = scalar_lea.vmem %s4985_s17, %s5069_s28 }
 0x9c6   : > { %v4034_v47 = vpop.f32.mrf.mxu0 }
 0x9c9   : > { %3252 = vrot.lane.b32.xlu1 %v2933_v36, %s5052_s22  ;;  %3270 = vrot.lane.b32.xlu0 %v3155_v42, %s5055_s23 }
 0x9cd   : > { %3255 = vrot.lane.b32.xlu1 %v2933_v36, %s5051_s21  ;;  %3273 = vrot.lane.b32.xlu0 %v3155_v42, %s4121_s0 }
 0x9d1   : > { %3277 = vrot.lane.b32.xlu0 %v3229_v46, %s5052_s22  ;;  %s5063_s22 = smov 127  }
 0x9d5   : > { %3280 = vrot.lane.b32.xlu0 %v3229_v46, %s5051_s21 }
 0xa2b   : > { %v3239_v55 = vpop.permute.xlu1 %3238 }
 0xa2c   : > { %v3284_v6 = vsel %vm5057_vm13, %v3283_v3, %v3239_v55 }
 0xa2f   : > { %v3242_v58 = vpop.permute.xlu1 %3241  ;;  %v3260_v59 = vpop.permute.xlu0 %3259 }
 0xa30   : > { %v3285_v10 = vsel %vm5058_vm3, %v3284_v6, %v3242_v58  ;;  %v3293_v27 = vsel %vm5059_vm5, %v4859_v38, %v3260_v59  ;;  %v3381_v38 = vld [vmem:[%s4980_s12] sm:$0xff] }
 0xa33   : > { %v3246_v20 = vpop.permute.xlu1 %3245  ;;  %v3264_v18 = vpop.permute.xlu0 %3263 }
 0xa34   : > { %v3287_v11 = vsel %vm3286_vm12, %v3285_v10, %v3246_v20  ;;  %v3294_v40 = vsel %vm5060_vm11, %v3293_v27, %v3264_v18 }
 0xa37   : > { %v3249_v61 = vpop.permute.xlu1 %3248  ;;  %v3267_v63 = vpop.permute.xlu0 %3266 }
 0xa38   : > { %v3289_v15 = vsel %vm3288_vm1, %v3287_v11, %v3249_v61  ;;  %v3295_v29 = vsel %vm5061_vm2, %v3294_v40, %v3267_v63 }
 0xa3b   : > { %v3253_v7 = vpop.permute.xlu1 %3252  ;;  %v3271_v9 = vpop.permute.xlu0 %3270 }
 0xa3c   : > { %v3291_v13 = vsel %vm3290_vm0, %v3289_v15, %v3253_v7  ;;  %v3296_v30 = vsel %vm3286_vm12, %v3295_v29, %v3271_v9 }
 0xa3f   : > { %v3256_v14 = vpop.permute.xlu1 %3255  ;;  %v3274_v16 = vpop.permute.xlu0 %3273 }
 0xa40   : > { %v3292_v19 = vsel %vm728_vm8, %v3291_v13, %v3256_v14  ;;  %v3297_v32 = vsel %vm3288_vm1, %v3296_v30, %v3274_v16 }
 0xa41   : > { %v4882_v26 = vadd.f32 %v3292_v19, %v2633_v12 }
 0xa43   : > { %v3278_v45 = vpop.permute.xlu0 %3277  ;;  %3362 = vrot.lane.b32.xlu0 %v4882_v26, %s5051_s21  ;;  %3370 = vrot.lane.b32.xlu1 %v4882_v26, %s5039_s30 }
 0xa44   : > { %v3298_v33 = vsel %vm3290_vm0, %v3297_v32, %v3278_v45 }
 0xa47   : > { %v3281_v34 = vpop.permute.xlu0 %3280  ;;  %3332 = vrot.lane.b32.xlu0 %v4882_v26, %s5062_s27  ;;  %3352 = vrot.lane.b32.xlu1 %v4882_v26, %s5040_s18 }
 0xa48   : > { %v3299_v35 = vsel %vm728_vm8, %v3298_v33, %v3281_v34 }
 0xa49   : > { %v3301_v36 = vadd.f32 %v3299_v35, %v2634_v8 }
 0xa4b   : > { %3372 = vrot.lane.b32.xlu0 %v3301_v36, %s5039_s30  ;;  %3342 = vrot.lane.b32.xlu1 %v4882_v26, %s5063_s22 }
 0xa4f   : > { %3354 = vrot.lane.b32.xlu0 %v3301_v36, %s5040_s18  ;;  %3364 = vrot.lane.b32.xlu1 %v3301_v36, %s5051_s21 }
 0xa53   : > { %3344 = vrot.lane.b32.xlu0 %v3301_v36, %s5063_s22  ;;  %3334 = vrot.lane.b32.xlu1 %v3301_v36, %s5062_s27 }
 0xa57   : > { %3322 = vrot.lane.b32.xlu0 %v4882_v26, %s5041_s26  ;;  %3324 = vrot.lane.b32.xlu1 %v3301_v36, %s5041_s26 }
 0xa5b   : > { %3304 = vrot.lane.b32.xlu0 %v4882_v26, %s5042_s1  ;;  %3306 = vrot.lane.b32.xlu1 %v3301_v36, %s5042_s1 }
 0xa5f   : > { %3314 = vrot.lane.b32.xlu0 %v4882_v26, %s5043_s20  ;;  %3316 = vrot.lane.b32.xlu1 %v3301_v36, %s5043_s20 }
 0xa63   : > { %3384 = vperm.xlu0 %4072, %v3381_v38   ;;  %3467 = vperm.xlu1 %4073, %v3464_v0  }
 0xab5   : > { %v3363_v39 = vpop.permute.xlu0 %3362  ;;  %v3371_v41 = vpop.permute.xlu1 %3370 }
 0xab9   : > { %v3333_v42 = vpop.permute.xlu0 %3332  ;;  %v3353_v43 = vpop.permute.xlu1 %3352 }
 0xaba   : > { %v3339_v63 = vsel %vm695_vm10, 0.0, %v3333_v42 }
 0xabb   : > { %v3340_v7 = vmul.f32 %v4300_v37, %v3339_v63 }
 0xabd   : > { %v3373_v44 = vpop.permute.xlu0 %3372  ;;  %v3343_v46 = vpop.permute.xlu1 %3342 }
 0xabe   : > { %v3374_v47 = vsel %vm737_vm4, %v3371_v41, %v3373_v44  ;;  %v3377_v48 = vsel %vm737_vm4, %v3373_v44, 0.0  ;;  %vm5064_vm4 = vcmask 121856  }
 0xabf   : > { %v3378_v49 = vmul.f32 %v4287_v24, %v3374_v47  ;;  %v3379_v50 = vmul.f32 %v4284_v23, %v3377_v48 }
 0xac1   : > { %3404 = vmatprep.subr.mxu1 %v3379_v50  ;;  %v3355_v51 = vpop.permute.xlu0 %3354  ;;  %v3365_v21 = vpop.permute.xlu1 %3364 }
 0xac2   : > { %v3356_v25 = vsel %vm717_vm7, %v3353_v43, %v3355_v51  ;;  %v3359_v52 = vsel %vm717_vm7, %v3355_v51, 0.0  ;;  %v3366_v53 = vsel %vm728_vm8, %v3363_v39, %v3365_v21  ;;  %3405 = vmatpush1.msra.mxu1 %v3378_v49  ;;  %vm5065_vm7 = vmmov %vm5064_vm4 }
 0xac3   : > { %v3360_v54 = vmul.f32 %v4300_v37, %v3356_v25  ;;  %v3361_v55 = vmul.f32 %v4294_v31, %v3359_v52  ;;  %3716 = vmatprep.subr.msk.mxu1 %vm728_vm8, %v3365_v21  ;;  %vm5066_vm8 = vcmask 138240  }
 0xac4   : > { %3407 = vmatpush1.msra.mxu1 %v3366_v53 }
 0xac5   : > { %v3345_v56 = vpop.permute.xlu0 %3344  ;;  %3408 = vmatprep.subr.mxu1 %v3361_v55  ;;  %v3335_v57 = vpop.permute.xlu1 %3334 }
 0xac6   : > { %v3346_v58 = vsel %vm706_vm9, %v3343_v46, %v3345_v56  ;;  %v3349_v59 = vsel %vm706_vm9, %v3345_v56, 0.0  ;;  %3409 = vmatpush1.msra.mxu1 %v3360_v54  ;;  %v3336_v61 = vsel %vm695_vm10, %v3333_v42, %v3335_v57  ;;  %vm5067_vm9 = vmmov %vm5066_vm8 }
 0xac7   : > { %v3350_v20 = vmul.f32 %v4287_v24, %v3346_v58  ;;  %v3351_v18 = vmul.f32 %v4284_v23, %v3349_v59  ;;  %v3341_v5 = vmul.f32 %v4294_v31, %v3336_v61  ;;  %vm5068_vm10 = vmmov %vm5059_vm5 }
 0xac9   : > { %v3323_v1 = vpop.permute.xlu0 %3322  ;;  %3410 = vmatprep.subr.mxu1 %v3351_v18  ;;  %v3325_v2 = vpop.permute.xlu1 %3324 }
 0xaca   : > { %v3326_v3 = vsel %vm5064_vm4, %v3323_v1, %v3325_v2  ;;  %3411 = vmatpush1.msra.mxu1 %v3350_v20  ;;  %v3329_v6 = vsel %vm5065_vm7, 0.0, %v3323_v1 }
 0xacb   : > { %3412 = vmatprep.subr.mxu1 %v3301_v36  ;;  %v3331_v9 = vmul.f32 %v4284_v23, %v3326_v3  ;;  %v3330_v11 = vmul.f32 %v4287_v24, %v3329_v6  ;;  %v3380_v24 = vld [vmem:[%s4979_s11] sm:$0xff] }
 0xacc   : > { %3413 = vmatpush1.msra.mxu1 %v4882_v26 }
 0xacd   : > { %v3305_v10 = vpop.permute.xlu0 %3304  ;;  %3414 = vmatprep.subr.mxu1 %v3341_v5  ;;  %v3307_v4 = vpop.permute.xlu1 %3306 }
 0xace   : > { %3415 = vmatpush1.msra.mxu1 %v3340_v7  ;;  %v3308_v15 = vsel %vm5066_vm8, %v3305_v10, %v3307_v4  ;;  %v3311_v12 = vsel %vm5067_vm9, 0.0, %v3305_v10 }
 0xacf   : > { %3416 = vmatprep.subr.mxu1 %v3331_v9  ;;  %v3313_v17 = vmul.f32 %v4294_v31, %v3308_v15  ;;  %v3312_v23 = vmul.f32 %v4300_v37, %v3311_v12  ;;  %v3463_v37 = vld [vmem:[%s4983_s15] sm:$0x7] }
 0xad0   : > { %3417 = vmatpush1.msra.mxu1 %v3330_v11 }
 0xad1   : > { %v3315_v13 = vpop.permute.xlu0 %3314  ;;  %v3317_v14 = vpop.permute.xlu1 %3316 }
 0xad2   : > { %v3318_v16 = vsel %vm5068_vm10, %v3315_v13, %v3317_v14 }
 0xad3   : > { %3418 = vmatprep.subr.mxu1 %v3318_v16 }
 0xad4   : > { %3718 = vmatpush1.msk.msra.mxu1 %vm4322_vm14, %v3315_v13 }
 0xad5   : > { %3420 = vmatprep.subr.mxu1 %v3313_v17 }
 0xad6   : > { %3421 = vmatpush1.msra.mxu1 %v3312_v23 }
 0xad7   : > { %3719 = vmatmul.mubr.msk.f32.vlgmr.msra.gmra.mxu1 %vm751_vm15, %v3380_v24 }
 0xade   : > { %v3385_v22 = vpop.permute.xlu0 %3384  ;;  %v3468_v45 = vpop.permute.xlu1 %3467 }
 0xb97   : > { %v3456_v19 = vpop.f32.mrf.mxu1 }
 0xb98   : > { %v3457_v26 = vadd.f32 %v3456_v19, %v3385_v22 }
 0xb99   : > { %v3458_v27 = vpop.f32.mrf.mxu1 }
 0xb9a   : > { %v3459_v31 = vadd.f32 %v3458_v27, %v3385_v22  ;;  %v3461_v40 = vmax.f32 %v3457_v26, 0.0 }
 0xb9c   : > { %v3462_v28 = vmax.f32 %v3459_v31, 0.0 }
 0xb9e   : > { %3503 = vmatprep.subr.mxu0 %v3462_v28 }
 0xb9f   : > { %3504 = vmatpush1.msra.mxu0 %v3461_v40 }
 0xba0   : > { %3720 = vmatmul.mubr.msk.f32.vlgmr.msra.gmra.mxu0 %vm2041_vm6, %v3463_v37 }
 0xc60   : > { %v3539_v62 = vpop.f32.mrf.mxu0 }
 0xc61   : > { %v3540_v60 = vadd.f32 %v3539_v62, %v3468_v45 }
 0xc62   : > { %v3541_v29 = vpop.f32.mrf.mxu0 }
 0xc63   : > { %v3542_v30 = vadd.f32 %v3541_v29, %v3468_v45 }
 0xc65   : > { %v3546_v32 = vcombine.low %v3540_v60, %v3542_v30 }
 0xc67   : > { %3548 = vst [vmem:[%s548_s3] sm:$0x77] %v3546_v32 }
 0xc68 PF: > { %s27_s24 = sadd.s32 1, %s4093_s24  }
 0xc69   : > { %p24_p4 = scmp.ge.s32.totalorder %s27_s24, 4  }
 0xc6b   :  { %26 = sbr.rel (!%p24_p4) target bundleno = 5 (0x5), region = 118 }

</bundles_post_ra>
